<compile_context>
chip_gen: v6e
topology: v6e:2x2x1
jax: 0.10.0
libtpu: 0.0.40
codegen_flags: <defaults>
</compile_context>

<pallas_src>
import functools

import jax
import jax.numpy as jnp
import numpy as np
from jax import lax
from jax.experimental import pallas as pl
from jax.experimental.pallas import tpu as pltpu

NEG_SLOPE = 0.3   # LeakyReLU slope; must be >= 0 for the pool-before-activation reorder
K = 3             # conv kernel size
P = 2             # max-pool kernel / stride


def conv_act_mp_kernel(x_ref, w_ref, b_ref, o_ref, *, D, H, W, cout, Dc):
    """One batch element per grid step.

    x_ref : (1, (D+2)*H, 3*W*Cin)  bf16  rows = (d_pad, h parity, ho), lanes = (kh, w, cin)
    w_ref : (3, 3*W*Cin, W*Cout)   bf16  banded weights, one matmul per kd tap
    b_ref : (1, Wo*Cout)           f32   bias tiled to the pooled lane layout (wo, cout)
    o_ref : (1, Do, Ho, Wo*Cout)   f32   pooled output, rows = ho, lanes = (wo, cout)
    """
    Ho, Wo = H // P, W // P
    half = Wo * cout

    for c in range(D // Dc):                            # static unroll; Dc output-d rows/chunk
        d0 = c * Dc

        # ---- conv: 3 banded matmuls (kd taps), accumulated in registers ----------------
        acc = None
        for kd in range(K):
            lo = (d0 + kd) * H                          # multiple of H (=16): aligned
            slab = x_ref[0, lo:lo + Dc * H, :]          # (Dc*H, 3*W*Cin) bf16
            part = jnp.dot(slab, w_ref[kd], preferred_element_type=jnp.float32)
            acc = part if acc is None else acc + part
        # acc: (Dc*H, W*Cout) f32, rows = (d_local, h parity, ho), lanes = (w parity, wo, co)

        # ---- 2x2x2 max-pool first (bias const per-channel, LeakyReLU monotone) ---------
        for p in range(Dc // P):
            a0 = acc[(P * p) * H:(P * p + 1) * H]       # d even  (H, W*Cout)
            a1 = acc[(P * p + 1) * H:(P * p + 2) * H]   # d odd
            m = jnp.maximum(a0, a1)                     # pool D
            m = jnp.maximum(m[:Ho], m[Ho:])             # pool H (rows pre-split by parity)
            m = jnp.maximum(m[:, :half], m[:, half:])   # pool W (lanes pre-split by parity)
            y = m + b_ref[...]                          # (Ho, Wo*Cout) + (1, Wo*Cout)
            y = jnp.where(y >= 0, y, y * NEG_SLOPE)     # LeakyReLU(0.3)
            o_ref[0, d0 // P + p] = y.astype(o_ref.dtype)


def _relayout_input(x_ncdhw, compute_dtype):
    """NCDHW -> (N, (D+2)*H, 3*W*Cin): rows=(d_pad, h parity, ho), lanes=(kh, w, cin).

    D and H zero padding and the kh window are realized here (one fused XLA relayout),
    so the kernel needs no staging buffer, no memset and no masked copies.
    """
    N, Cin, D, H, W = x_ncdhw.shape
    Ho = H // P
    xt = jnp.transpose(x_ncdhw, (0, 2, 3, 4, 1))                        # (N, D, H, W, Cin)
    xp = jnp.pad(xt, ((0, 0), (1, 1), (1, 1), (0, 0), (0, 0)))          # pad D, H by 1
    xk = jnp.stack([xp[:, :, kh:kh + H] for kh in range(K)], axis=3)    # (N, D+2, H, 3, W, Cin)
    # h -> (ho, hh) with h = 2*ho + hh, then put the parity bit (hh) major within a d block.
    xk = xk.reshape(N, D + 2, Ho, P, K, W, Cin).transpose(0, 1, 3, 2, 4, 5, 6)
    return xk.reshape(N, (D + 2) * H, K * W * Cin).astype(compute_dtype)


def _build_banded_weights(weight, W):
    """(Cout, Cin, 3, 3, 3) -> (3, 3*W*Cin, W*Cout) banded weights.

    Contraction lanes ordered (kh, wi, cin); output lanes ordered (w parity, wo, cout) so
    the W max-pool is a single half-lane compare.  The band realizes the kw taps and the
    W-boundary zero padding (out-of-range taps get zero rows).
    """
    Cout, Cin = weight.shape[0], weight.shape[1]
    Wo = W // P
    sel = np.zeros((W, K, W), dtype=np.float32)        # sel[wi, kw, w] = [wi == w + kw - 1]
    for kw in range(K):
        for w in range(W):
            wi = w + kw - 1
            if 0 <= wi < W:
                sel[wi, kw, w] = 1.0
    wt = jnp.transpose(weight, (2, 3, 4, 1, 0))        # (kd, kh, kw, cin, cout)
    band = jnp.einsum('xkw,dhkio->dhxiwo', jnp.asarray(sel), wt)   # (kd, kh, wi, cin, w, cout)
    band = band.reshape(K, K, W, Cin, Wo, P, Cout).transpose(0, 1, 2, 3, 5, 4, 6)
    return band.reshape(K, K * W * Cin, W * Cout)


def conv3d_act_mp(x_ncdhw, weight_oik3, bias, *, compute_dtype=jnp.bfloat16):
    """x: (N, Cin, D, H, W); weight: (Cout, Cin, 3, 3, 3); bias: (Cout,). Returns NCDHW f32."""
    N, Cin, D, H, W = x_ncdhw.shape
    Cout = weight_oik3.shape[0]
    assert D % P == 0 and H % P == 0 and W % P == 0, \
        "MaxPool3d(k=2,s=2) path assumes even spatial dims"
    assert NEG_SLOPE >= 0.0, "pool-before-(bias+LeakyReLU) requires a monotone activation"
    Do, Ho, Wo = D // P, H // P, W // P
    Dc = 4 if D % 4 == 0 else 2                        # output-d rows held in registers per chunk

    x2 = _relayout_input(x_ncdhw, compute_dtype)                          # (N, (D+2)*H, 3*W*Cin)
    band = _build_banded_weights(weight_oik3.astype(jnp.float32), W).astype(compute_dtype)
    b_tiled = jnp.tile(bias.astype(jnp.float32), Wo)[None, :]             # (1, Wo*Cout)

    flops = 2 * N * K * (D * H) * (K * W * Cin) * (W * Cout)
    bytes_accessed = (x2.size * x2.dtype.itemsize + band.size * band.dtype.itemsize
                      + b_tiled.size * 4 + N * Do * Ho * Wo * Cout * 4)

    kern = functools.partial(conv_act_mp_kernel, D=D, H=H, W=W, cout=Cout, Dc=Dc)
    out = pl.pallas_call(
        kern,
        out_shape=jax.ShapeDtypeStruct((N, Do, Ho, Wo * Cout), jnp.float32),
        grid=(N,),
        in_specs=[
            pl.BlockSpec((1, (D + 2) * H, K * W * Cin), lambda n: (n, 0, 0)),
            pl.BlockSpec((K, K * W * Cin, W * Cout), lambda n: (0, 0, 0)),
            pl.BlockSpec((1, Wo * Cout), lambda n: (0, 0)),
        ],
        out_specs=pl.BlockSpec((1, Do, Ho, Wo * Cout), lambda n: (n, 0, 0, 0)),
        compiler_params=pltpu.CompilerParams(dimension_semantics=("parallel",)),
        cost_estimate=pl.CostEstimate(flops=flops, transcendentals=0,
                                      bytes_accessed=bytes_accessed),
    )(x2, band, b_tiled)
    # TODO(synk): for large volumes add a second "parallel" grid axis over D chunks with a
    #   1-slab halo (fits v7x's 64 MiB VMEM and uses both TensorCores when N==1), and cap the
    #   W fold into lane groups of 8-16 so the band stays O(group*W) rather than O(W^2).
    # TODO(synk): on v7x, accumulate the kd taps in the MXU result buffer via
    #   pltpu.matmul_push_rhs / matmul_acc_lhs / matmul_pop instead of register adds.

    out = out.reshape(N, Do, Ho, Wo, Cout)
    return jnp.transpose(out, (0, 4, 1, 2, 3))         # back to NCDHW


def reference(x_ncdhw, weight_oik3, bias):
    """Plain-JAX reference matching PyTorch semantics (isbn=False path)."""
    x = jnp.transpose(x_ncdhw, (0, 2, 3, 4, 1))
    w = jnp.transpose(weight_oik3, (2, 3, 4, 1, 0))    # DHWIO
    y = lax.conv_general_dilated(
        x, w, window_strides=(1, 1, 1),
        padding=((1, 1), (1, 1), (1, 1)),
        dimension_numbers=("NDHWC", "DHWIO", "NDHWC"))
    y = y + bias
    y = jnp.where(y >= 0, y, y * NEG_SLOPE)
    y = lax.reduce_window(y, -jnp.inf, lax.max,
                          window_dimensions=(1, P, P, P, 1),
                          window_strides=(1, P, P, P, 1), padding="VALID")
    return jnp.transpose(y, (0, 4, 1, 2, 3))


if __name__ == "__main__":
    N, Cin, Cout, D, H, W = 2, 4, 8, 16, 16, 16

    key = jax.random.PRNGKey(0)
    kx, kwt, kb = jax.random.split(key, 3)

    # Input (PyTorch NCDHW convention).
    x = jax.random.normal(kx, (N, Cin, D, H, W), dtype=jnp.float32)

    # Deterministic parameter init mirroring the module's __init__:
    # xavier_uniform_ on conv.weight (gain=1), zeros on conv.bias.
    fan_in = Cin * K * K * K
    fan_out = Cout * K * K * K
    bound = float(np.sqrt(6.0 / (fan_in + fan_out)))
    weight = jax.random.uniform(kwt, (Cout, Cin, K, K, K),
                                minval=-bound, maxval=bound, dtype=jnp.float32)
    bias = jnp.zeros((Cout,), dtype=jnp.float32)

    # Round operands to bf16 precision so the f32 reference and the bf16-MXU kernel see
    # identical inputs (bf16 products are exact in f32; only accumulation order differs).
    xq = x.astype(jnp.bfloat16).astype(jnp.float32)
    wq = weight.astype(jnp.bfloat16).astype(jnp.float32)

    fwd = jax.jit(conv3d_act_mp)
    ref_fn = jax.jit(reference)

    out = jax.block_until_ready(fwd(xq, wq, bias))
    ref = jax.block_until_ready(ref_fn(xq, wq, bias))
    assert out.shape == (N, Cout, D // P, H // P, W // P)
    np.testing.assert_allclose(np.asarray(out), np.asarray(ref), rtol=1e-3, atol=1e-3)

    # Non-zero bias exercises the pool-before-(bias+LeakyReLU) epilogue reordering.
    bias2 = 0.1 * jax.random.normal(kb, (Cout,), dtype=jnp.float32)
    out2 = jax.block_until_ready(fwd(xq, wq, bias2))
    ref2 = jax.block_until_ready(ref_fn(xq, wq, bias2))
    np.testing.assert_allclose(np.asarray(out2), np.asarray(ref2), rtol=1e-3, atol=1e-3)

    # TODO(synk): BatchNorm3d path (isbn=True) not implemented; module default is isbn=False.
    print("KERNEL_OK")
</pallas_src>

<mosaic_0001>
module attributes {stable_mosaic.version = 11 : i64} {
  func.func @conv_act_mp_kernel(%arg0: i32, %arg1: memref<1x288x192xbf16, #tpu.memory_space<vmem>>, %arg2: memref<3x192x128xbf16, #tpu.memory_space<vmem>>, %arg3: memref<1x64xf32, #tpu.memory_space<vmem>>, %arg4: memref<1x8x8x64xf32, #tpu.memory_space<vmem>>) attributes {dimension_semantics = [#tpu.dimension_semantics<parallel>], iteration_bounds = array<i64: 2>, scalar_prefetch = 0 : i64, scratch_operands = 0 : i64, tpu.core_type = #tpu.core_type<tc>, window_params = [{transform_indices = @transform_0, window_bounds = array<i64: 1, 288, 192>}, {pipeline_mode = #tpu.pipeline_mode<synchronous>, transform_indices = @transform_1, window_bounds = array<i64: 3, 192, 128>}, {pipeline_mode = #tpu.pipeline_mode<synchronous>, transform_indices = @transform_2, window_bounds = array<i64: 1, 64>}, {transform_indices = @transform_3, window_bounds = array<i64: 1, 8, 8, 64>}]} {
    %c0 = arith.constant 0 : index
    %c0_0 = arith.constant 0 : index
    %c0_1 = arith.constant 0 : index
    %0 = vector.load %arg1[%c0, %c0_0, %c0_1] : memref<1x288x192xbf16, #tpu.memory_space<vmem>>, vector<1x64x192xbf16>
    %1 = vector.shape_cast %0 : vector<1x64x192xbf16> to vector<64x192xbf16>
    %c0_2 = arith.constant 0 : index
    %c0_3 = arith.constant 0 : index
    %c0_4 = arith.constant 0 : index
    %2 = vector.load %arg2[%c0_2, %c0_3, %c0_4] : memref<3x192x128xbf16, #tpu.memory_space<vmem>>, vector<1x192x128xbf16>
    %3 = vector.shape_cast %2 : vector<1x192x128xbf16> to vector<192x128xbf16>
    %cst = arith.constant dense<0.000000e+00> : vector<64x128xf32>
    %4 = tpu.matmul %1, %3, %cst {dimension_numbers = #tpu.dot_dimension_numbers<[1], [0], [0], [1], [0, 0, 1, 1], [], []>} : vector<64x192xbf16>, vector<192x128xbf16>, vector<64x128xf32> -> vector<64x128xf32>
    %c0_5 = arith.constant 0 : index
    %c16 = arith.constant 16 : index
    %c0_6 = arith.constant 0 : index
    %5 = vector.load %arg1[%c0_5, %c16, %c0_6] : memref<1x288x192xbf16, #tpu.memory_space<vmem>>, vector<1x64x192xbf16>
    %6 = vector.shape_cast %5 : vector<1x64x192xbf16> to vector<64x192xbf16>
    %c1 = arith.constant 1 : index
    %c0_7 = arith.constant 0 : index
    %c0_8 = arith.constant 0 : index
    %7 = vector.load %arg2[%c1, %c0_7, %c0_8] : memref<3x192x128xbf16, #tpu.memory_space<vmem>>, vector<1x192x128xbf16>
    %8 = vector.shape_cast %7 : vector<1x192x128xbf16> to vector<192x128xbf16>
    %cst_9 = arith.constant dense<0.000000e+00> : vector<64x128xf32>
    %9 = tpu.matmul %6, %8, %cst_9 {dimension_numbers = #tpu.dot_dimension_numbers<[1], [0], [0], [1], [0, 0, 1, 1], [], []>} : vector<64x192xbf16>, vector<192x128xbf16>, vector<64x128xf32> -> vector<64x128xf32>
    %10 = arith.addf %4, %9 : vector<64x128xf32>
    %c0_10 = arith.constant 0 : index
    %c32 = arith.constant 32 : index
    %c0_11 = arith.constant 0 : index
    %11 = vector.load %arg1[%c0_10, %c32, %c0_11] : memref<1x288x192xbf16, #tpu.memory_space<vmem>>, vector<1x64x192xbf16>
    %12 = vector.shape_cast %11 : vector<1x64x192xbf16> to vector<64x192xbf16>
    %c2 = arith.constant 2 : index
    %c0_12 = arith.constant 0 : index
    %c0_13 = arith.constant 0 : index
    %13 = vector.load %arg2[%c2, %c0_12, %c0_13] : memref<3x192x128xbf16, #tpu.memory_space<vmem>>, vector<1x192x128xbf16>
    %14 = vector.shape_cast %13 : vector<1x192x128xbf16> to vector<192x128xbf16>
    %cst_14 = arith.constant dense<0.000000e+00> : vector<64x128xf32>
    %15 = tpu.matmul %12, %14, %cst_14 {dimension_numbers = #tpu.dot_dimension_numbers<[1], [0], [0], [1], [0, 0, 1, 1], [], []>} : vector<64x192xbf16>, vector<192x128xbf16>, vector<64x128xf32> -> vector<64x128xf32>
    %16 = arith.addf %10, %15 : vector<64x128xf32>
    %17 = vector.extract_strided_slice %16 {offsets = [0, 0], sizes = [16, 128], strides = [1, 1]} : vector<64x128xf32> to vector<16x128xf32>
    %18 = vector.extract_strided_slice %16 {offsets = [16, 0], sizes = [16, 128], strides = [1, 1]} : vector<64x128xf32> to vector<16x128xf32>
    %19 = arith.maximumf %17, %18 : vector<16x128xf32>
    %20 = vector.extract_strided_slice %19 {offsets = [0, 0], sizes = [8, 128], strides = [1, 1]} : vector<16x128xf32> to vector<8x128xf32>
    %21 = vector.extract_strided_slice %19 {offsets = [8, 0], sizes = [8, 128], strides = [1, 1]} : vector<16x128xf32> to vector<8x128xf32>
    %22 = arith.maximumf %20, %21 : vector<8x128xf32>
    %23 = vector.extract_strided_slice %22 {offsets = [0, 0], sizes = [8, 64], strides = [1, 1]} : vector<8x128xf32> to vector<8x64xf32>
    %24 = vector.extract_strided_slice %22 {offsets = [0, 64], sizes = [8, 64], strides = [1, 1]} : vector<8x128xf32> to vector<8x64xf32>
    %25 = arith.maximumf %23, %24 : vector<8x64xf32>
    %c0_15 = arith.constant 0 : index
    %c0_16 = arith.constant 0 : index
    %26 = vector.load %arg3[%c0_15, %c0_16] : memref<1x64xf32, #tpu.memory_space<vmem>>, vector<1x64xf32>
    %27 = vector.broadcast %26 : vector<1x64xf32> to vector<8x64xf32>
    %28 = arith.addf %25, %27 : vector<8x64xf32>
    %cst_17 = arith.constant 0.000000e+00 : f32
    %29 = vector.broadcast %cst_17 : f32 to vector<8x64xf32>
    %30 = arith.cmpf oge, %28, %29 : vector<8x64xf32>
    %cst_18 = arith.constant 3.000000e-01 : f32
    %31 = vector.broadcast %cst_18 : f32 to vector<8x64xf32>
    %32 = arith.mulf %28, %31 : vector<8x64xf32>
    %33 = arith.select %30, %28, %32 : vector<8x64xi1>, vector<8x64xf32>
    %c0_19 = arith.constant 0 : index
    %c0_20 = arith.constant 0 : index
    %c0_21 = arith.constant 0 : index
    %c0_22 = arith.constant 0 : index
    %34 = vector.load %arg4[%c0_19, %c0_20, %c0_21, %c0_22] : memref<1x8x8x64xf32, #tpu.memory_space<vmem>>, vector<1x1x8x64xf32>
    %35 = vector.shape_cast %34 : vector<1x1x8x64xf32> to vector<8x64xf32>
    %36 = vector.shape_cast %33 : vector<8x64xf32> to vector<1x1x8x64xf32>
    tpu.vector_store %arg4[%c0_19, %c0_20, %c0_21, %c0_22], %36 {strides = array<i32>} : memref<1x8x8x64xf32, #tpu.memory_space<vmem>>, vector<1x1x8x64xf32>,
    %37 = vector.extract_strided_slice %16 {offsets = [32, 0], sizes = [16, 128], strides = [1, 1]} : vector<64x128xf32> to vector<16x128xf32>
    %38 = vector.extract_strided_slice %16 {offsets = [48, 0], sizes = [16, 128], strides = [1, 1]} : vector<64x128xf32> to vector<16x128xf32>
    %39 = arith.maximumf %37, %38 : vector<16x128xf32>
    %40 = vector.extract_strided_slice %39 {offsets = [0, 0], sizes = [8, 128], strides = [1, 1]} : vector<16x128xf32> to vector<8x128xf32>
    %41 = vector.extract_strided_slice %39 {offsets = [8, 0], sizes = [8, 128], strides = [1, 1]} : vector<16x128xf32> to vector<8x128xf32>
    %42 = arith.maximumf %40, %41 : vector<8x128xf32>
    %43 = vector.extract_strided_slice %42 {offsets = [0, 0], sizes = [8, 64], strides = [1, 1]} : vector<8x128xf32> to vector<8x64xf32>
    %44 = vector.extract_strided_slice %42 {offsets = [0, 64], sizes = [8, 64], strides = [1, 1]} : vector<8x128xf32> to vector<8x64xf32>
    %45 = arith.maximumf %43, %44 : vector<8x64xf32>
    %c0_23 = arith.constant 0 : index
    %c0_24 = arith.constant 0 : index
    %46 = vector.load %arg3[%c0_23, %c0_24] : memref<1x64xf32, #tpu.memory_space<vmem>>, vector<1x64xf32>
    %47 = vector.broadcast %46 : vector<1x64xf32> to vector<8x64xf32>
    %48 = arith.addf %45, %47 : vector<8x64xf32>
    %cst_25 = arith.constant 0.000000e+00 : f32
    %49 = vector.broadcast %cst_25 : f32 to vector<8x64xf32>
    %50 = arith.cmpf oge, %48, %49 : vector<8x64xf32>
    %cst_26 = arith.constant 3.000000e-01 : f32
    %51 = vector.broadcast %cst_26 : f32 to vector<8x64xf32>
    %52 = arith.mulf %48, %51 : vector<8x64xf32>
    %53 = arith.select %50, %48, %52 : vector<8x64xi1>, vector<8x64xf32>
    %c0_27 = arith.constant 0 : index
    %c1_28 = arith.constant 1 : index
    %c0_29 = arith.constant 0 : index
    %c0_30 = arith.constant 0 : index
    %54 = vector.load %arg4[%c0_27, %c1_28, %c0_29, %c0_30] : memref<1x8x8x64xf32, #tpu.memory_space<vmem>>, vector<1x1x8x64xf32>
    %55 = vector.shape_cast %54 : vector<1x1x8x64xf32> to vector<8x64xf32>
    %56 = vector.shape_cast %53 : vector<8x64xf32> to vector<1x1x8x64xf32>
    tpu.vector_store %arg4[%c0_27, %c1_28, %c0_29, %c0_30], %56 {strides = array<i32>} : memref<1x8x8x64xf32, #tpu.memory_space<vmem>>, vector<1x1x8x64xf32>,
    %c0_31 = arith.constant 0 : index
    %c64 = arith.constant 64 : index
    %c0_32 = arith.constant 0 : index
    %57 = vector.load %arg1[%c0_31, %c64, %c0_32] : memref<1x288x192xbf16, #tpu.memory_space<vmem>>, vector<1x64x192xbf16>
    %58 = vector.shape_cast %57 : vector<1x64x192xbf16> to vector<64x192xbf16>
    %c0_33 = arith.constant 0 : index
    %c0_34 = arith.constant 0 : index
    %c0_35 = arith.constant 0 : index
    %59 = vector.load %arg2[%c0_33, %c0_34, %c0_35] : memref<3x192x128xbf16, #tpu.memory_space<vmem>>, vector<1x192x128xbf16>
    %60 = vector.shape_cast %59 : vector<1x192x128xbf16> to vector<192x128xbf16>
    %cst_36 = arith.constant dense<0.000000e+00> : vector<64x128xf32>
    %61 = tpu.matmul %58, %60, %cst_36 {dimension_numbers = #tpu.dot_dimension_numbers<[1], [0], [0], [1], [0, 0, 1, 1], [], []>} : vector<64x192xbf16>, vector<192x128xbf16>, vector<64x128xf32> -> vector<64x128xf32>
    %c0_37 = arith.constant 0 : index
    %c80 = arith.constant 80 : index
    %c0_38 = arith.constant 0 : index
    %62 = vector.load %arg1[%c0_37, %c80, %c0_38] : memref<1x288x192xbf16, #tpu.memory_space<vmem>>, vector<1x64x192xbf16>
    %63 = vector.shape_cast %62 : vector<1x64x192xbf16> to vector<64x192xbf16>
    %c1_39 = arith.constant 1 : index
    %c0_40 = arith.constant 0 : index
    %c0_41 = arith.constant 0 : index
    %64 = vector.load %arg2[%c1_39, %c0_40, %c0_41] : memref<3x192x128xbf16, #tpu.memory_space<vmem>>, vector<1x192x128xbf16>
    %65 = vector.shape_cast %64 : vector<1x192x128xbf16> to vector<192x128xbf16>
    %cst_42 = arith.constant dense<0.000000e+00> : vector<64x128xf32>
    %66 = tpu.matmul %63, %65, %cst_42 {dimension_numbers = #tpu.dot_dimension_numbers<[1], [0], [0], [1], [0, 0, 1, 1], [], []>} : vector<64x192xbf16>, vector<192x128xbf16>, vector<64x128xf32> -> vector<64x128xf32>
    %67 = arith.addf %61, %66 : vector<64x128xf32>
    %c0_43 = arith.constant 0 : index
    %c96 = arith.constant 96 : index
    %c0_44 = arith.constant 0 : index
    %68 = vector.load %arg1[%c0_43, %c96, %c0_44] : memref<1x288x192xbf16, #tpu.memory_space<vmem>>, vector<1x64x192xbf16>
    %69 = vector.shape_cast %68 : vector<1x64x192xbf16> to vector<64x192xbf16>
    %c2_45 = arith.constant 2 : index
    %c0_46 = arith.constant 0 : index
    %c0_47 = arith.constant 0 : index
    %70 = vector.load %arg2[%c2_45, %c0_46, %c0_47] : memref<3x192x128xbf16, #tpu.memory_space<vmem>>, vector<1x192x128xbf16>
    %71 = vector.shape_cast %70 : vector<1x192x128xbf16> to vector<192x128xbf16>
    %cst_48 = arith.constant dense<0.000000e+00> : vector<64x128xf32>
    %72 = tpu.matmul %69, %71, %cst_48 {dimension_numbers = #tpu.dot_dimension_numbers<[1], [0], [0], [1], [0, 0, 1, 1], [], []>} : vector<64x192xbf16>, vector<192x128xbf16>, vector<64x128xf32> -> vector<64x128xf32>
    %73 = arith.addf %67, %72 : vector<64x128xf32>
    %74 = vector.extract_strided_slice %73 {offsets = [0, 0], sizes = [16, 128], strides = [1, 1]} : vector<64x128xf32> to vector<16x128xf32>
    %75 = vector.extract_strided_slice %73 {offsets = [16, 0], sizes = [16, 128], strides = [1, 1]} : vector<64x128xf32> to vector<16x128xf32>
    %76 = arith.maximumf %74, %75 : vector<16x128xf32>
    %77 = vector.extract_strided_slice %76 {offsets = [0, 0], sizes = [8, 128], strides = [1, 1]} : vector<16x128xf32> to vector<8x128xf32>
    %78 = vector.extract_strided_slice %76 {offsets = [8, 0], sizes = [8, 128], strides = [1, 1]} : vector<16x128xf32> to vector<8x128xf32>
    %79 = arith.maximumf %77, %78 : vector<8x128xf32>
    %80 = vector.extract_strided_slice %79 {offsets = [0, 0], sizes = [8, 64], strides = [1, 1]} : vector<8x128xf32> to vector<8x64xf32>
    %81 = vector.extract_strided_slice %79 {offsets = [0, 64], sizes = [8, 64], strides = [1, 1]} : vector<8x128xf32> to vector<8x64xf32>
    %82 = arith.maximumf %80, %81 : vector<8x64xf32>
    %c0_49 = arith.constant 0 : index
    %c0_50 = arith.constant 0 : index
    %83 = vector.load %arg3[%c0_49, %c0_50] : memref<1x64xf32, #tpu.memory_space<vmem>>, vector<1x64xf32>
    %84 = vector.broadcast %83 : vector<1x64xf32> to vector<8x64xf32>
    %85 = arith.addf %82, %84 : vector<8x64xf32>
    %cst_51 = arith.constant 0.000000e+00 : f32
    %86 = vector.broadcast %cst_51 : f32 to vector<8x64xf32>
    %87 = arith.cmpf oge, %85, %86 : vector<8x64xf32>
    %cst_52 = arith.constant 3.000000e-01 : f32
    %88 = vector.broadcast %cst_52 : f32 to vector<8x64xf32>
    %89 = arith.mulf %85, %88 : vector<8x64xf32>
    %90 = arith.select %87, %85, %89 : vector<8x64xi1>, vector<8x64xf32>
    %c0_53 = arith.constant 0 : index
    %c2_54 = arith.constant 2 : index
    %c0_55 = arith.constant 0 : index
    %c0_56 = arith.constant 0 : index
    %91 = vector.load %arg4[%c0_53, %c2_54, %c0_55, %c0_56] : memref<1x8x8x64xf32, #tpu.memory_space<vmem>>, vector<1x1x8x64xf32>
    %92 = vector.shape_cast %91 : vector<1x1x8x64xf32> to vector<8x64xf32>
    %93 = vector.shape_cast %90 : vector<8x64xf32> to vector<1x1x8x64xf32>
    tpu.vector_store %arg4[%c0_53, %c2_54, %c0_55, %c0_56], %93 {strides = array<i32>} : memref<1x8x8x64xf32, #tpu.memory_space<vmem>>, vector<1x1x8x64xf32>,
    %94 = vector.extract_strided_slice %73 {offsets = [32, 0], sizes = [16, 128], strides = [1, 1]} : vector<64x128xf32> to vector<16x128xf32>
    %95 = vector.extract_strided_slice %73 {offsets = [48, 0], sizes = [16, 128], strides = [1, 1]} : vector<64x128xf32> to vector<16x128xf32>
    %96 = arith.maximumf %94, %95 : vector<16x128xf32>
    %97 = vector.extract_strided_slice %96 {offsets = [0, 0], sizes = [8, 128], strides = [1, 1]} : vector<16x128xf32> to vector<8x128xf32>
    %98 = vector.extract_strided_slice %96 {offsets = [8, 0], sizes = [8, 128], strides = [1, 1]} : vector<16x128xf32> to vector<8x128xf32>
    %99 = arith.maximumf %97, %98 : vector<8x128xf32>
    %100 = vector.extract_strided_slice %99 {offsets = [0, 0], sizes = [8, 64], strides = [1, 1]} : vector<8x128xf32> to vector<8x64xf32>
    %101 = vector.extract_strided_slice %99 {offsets = [0, 64], sizes = [8, 64], strides = [1, 1]} : vector<8x128xf32> to vector<8x64xf32>
    %102 = arith.maximumf %100, %101 : vector<8x64xf32>
    %c0_57 = arith.constant 0 : index
    %c0_58 = arith.constant 0 : index
    %103 = vector.load %arg3[%c0_57, %c0_58] : memref<1x64xf32, #tpu.memory_space<vmem>>, vector<1x64xf32>
    %104 = vector.broadcast %103 : vector<1x64xf32> to vector<8x64xf32>
    %105 = arith.addf %102, %104 : vector<8x64xf32>
    %cst_59 = arith.constant 0.000000e+00 : f32
    %106 = vector.broadcast %cst_59 : f32 to vector<8x64xf32>
    %107 = arith.cmpf oge, %105, %106 : vector<8x64xf32>
    %cst_60 = arith.constant 3.000000e-01 : f32
    %108 = vector.broadcast %cst_60 : f32 to vector<8x64xf32>
    %109 = arith.mulf %105, %108 : vector<8x64xf32>
    %110 = arith.select %107, %105, %109 : vector<8x64xi1>, vector<8x64xf32>
    %c0_61 = arith.constant 0 : index
    %c3 = arith.constant 3 : index
    %c0_62 = arith.constant 0 : index
    %c0_63 = arith.constant 0 : index
    %111 = vector.load %arg4[%c0_61, %c3, %c0_62, %c0_63] : memref<1x8x8x64xf32, #tpu.memory_space<vmem>>, vector<1x1x8x64xf32>
    %112 = vector.shape_cast %111 : vector<1x1x8x64xf32> to vector<8x64xf32>
    %113 = vector.shape_cast %110 : vector<8x64xf32> to vector<1x1x8x64xf32>
    tpu.vector_store %arg4[%c0_61, %c3, %c0_62, %c0_63], %113 {strides = array<i32>} : memref<1x8x8x64xf32, #tpu.memory_space<vmem>>, vector<1x1x8x64xf32>,
    %c0_64 = arith.constant 0 : index
    %c128 = arith.constant 128 : index
    %c0_65 = arith.constant 0 : index
    %114 = vector.load %arg1[%c0_64, %c128, %c0_65] : memref<1x288x192xbf16, #tpu.memory_space<vmem>>, vector<1x64x192xbf16>
    %115 = vector.shape_cast %114 : vector<1x64x192xbf16> to vector<64x192xbf16>
    %c0_66 = arith.constant 0 : index
    %c0_67 = arith.constant 0 : index
    %c0_68 = arith.constant 0 : index
    %116 = vector.load %arg2[%c0_66, %c0_67, %c0_68] : memref<3x192x128xbf16, #tpu.memory_space<vmem>>, vector<1x192x128xbf16>
    %117 = vector.shape_cast %116 : vector<1x192x128xbf16> to vector<192x128xbf16>
    %cst_69 = arith.constant dense<0.000000e+00> : vector<64x128xf32>
    %118 = tpu.matmul %115, %117, %cst_69 {dimension_numbers = #tpu.dot_dimension_numbers<[1], [0], [0], [1], [0, 0, 1, 1], [], []>} : vector<64x192xbf16>, vector<192x128xbf16>, vector<64x128xf32> -> vector<64x128xf32>
    %c0_70 = arith.constant 0 : index
    %c144 = arith.constant 144 : index
    %c0_71 = arith.constant 0 : index
    %119 = vector.load %arg1[%c0_70, %c144, %c0_71] : memref<1x288x192xbf16, #tpu.memory_space<vmem>>, vector<1x64x192xbf16>
    %120 = vector.shape_cast %119 : vector<1x64x192xbf16> to vector<64x192xbf16>
    %c1_72 = arith.constant 1 : index
    %c0_73 = arith.constant 0 : index
    %c0_74 = arith.constant 0 : index
    %121 = vector.load %arg2[%c1_72, %c0_73, %c0_74] : memref<3x192x128xbf16, #tpu.memory_space<vmem>>, vector<1x192x128xbf16>
    %122 = vector.shape_cast %121 : vector<1x192x128xbf16> to vector<192x128xbf16>
    %cst_75 = arith.constant dense<0.000000e+00> : vector<64x128xf32>
    %123 = tpu.matmul %120, %122, %cst_75 {dimension_numbers = #tpu.dot_dimension_numbers<[1], [0], [0], [1], [0, 0, 1, 1], [], []>} : vector<64x192xbf16>, vector<192x128xbf16>, vector<64x128xf32> -> vector<64x128xf32>
    %124 = arith.addf %118, %123 : vector<64x128xf32>
    %c0_76 = arith.constant 0 : index
    %c160 = arith.constant 160 : index
    %c0_77 = arith.constant 0 : index
    %125 = vector.load %arg1[%c0_76, %c160, %c0_77] : memref<1x288x192xbf16, #tpu.memory_space<vmem>>, vector<1x64x192xbf16>
    %126 = vector.shape_cast %125 : vector<1x64x192xbf16> to vector<64x192xbf16>
    %c2_78 = arith.constant 2 : index
    %c0_79 = arith.constant 0 : index
    %c0_80 = arith.constant 0 : index
    %127 = vector.load %arg2[%c2_78, %c0_79, %c0_80] : memref<3x192x128xbf16, #tpu.memory_space<vmem>>, vector<1x192x128xbf16>
    %128 = vector.shape_cast %127 : vector<1x192x128xbf16> to vector<192x128xbf16>
    %cst_81 = arith.constant dense<0.000000e+00> : vector<64x128xf32>
    %129 = tpu.matmul %126, %128, %cst_81 {dimension_numbers = #tpu.dot_dimension_numbers<[1], [0], [0], [1], [0, 0, 1, 1], [], []>} : vector<64x192xbf16>, vector<192x128xbf16>, vector<64x128xf32> -> vector<64x128xf32>
    %130 = arith.addf %124, %129 : vector<64x128xf32>
    %131 = vector.extract_strided_slice %130 {offsets = [0, 0], sizes = [16, 128], strides = [1, 1]} : vector<64x128xf32> to vector<16x128xf32>
    %132 = vector.extract_strided_slice %130 {offsets = [16, 0], sizes = [16, 128], strides = [1, 1]} : vector<64x128xf32> to vector<16x128xf32>
    %133 = arith.maximumf %131, %132 : vector<16x128xf32>
    %134 = vector.extract_strided_slice %133 {offsets = [0, 0], sizes = [8, 128], strides = [1, 1]} : vector<16x128xf32> to vector<8x128xf32>
    %135 = vector.extract_strided_slice %133 {offsets = [8, 0], sizes = [8, 128], strides = [1, 1]} : vector<16x128xf32> to vector<8x128xf32>
    %136 = arith.maximumf %134, %135 : vector<8x128xf32>
    %137 = vector.extract_strided_slice %136 {offsets = [0, 0], sizes = [8, 64], strides = [1, 1]} : vector<8x128xf32> to vector<8x64xf32>
    %138 = vector.extract_strided_slice %136 {offsets = [0, 64], sizes = [8, 64], strides = [1, 1]} : vector<8x128xf32> to vector<8x64xf32>
    %139 = arith.maximumf %137, %138 : vector<8x64xf32>
    %c0_82 = arith.constant 0 : index
    %c0_83 = arith.constant 0 : index
    %140 = vector.load %arg3[%c0_82, %c0_83] : memref<1x64xf32, #tpu.memory_space<vmem>>, vector<1x64xf32>
    %141 = vector.broadcast %140 : vector<1x64xf32> to vector<8x64xf32>
    %142 = arith.addf %139, %141 : vector<8x64xf32>
    %cst_84 = arith.constant 0.000000e+00 : f32
    %143 = vector.broadcast %cst_84 : f32 to vector<8x64xf32>
    %144 = arith.cmpf oge, %142, %143 : vector<8x64xf32>
    %cst_85 = arith.constant 3.000000e-01 : f32
    %145 = vector.broadcast %cst_85 : f32 to vector<8x64xf32>
    %146 = arith.mulf %142, %145 : vector<8x64xf32>
    %147 = arith.select %144, %142, %146 : vector<8x64xi1>, vector<8x64xf32>
    %c0_86 = arith.constant 0 : index
    %c4 = arith.constant 4 : index
    %c0_87 = arith.constant 0 : index
    %c0_88 = arith.constant 0 : index
    %148 = vector.load %arg4[%c0_86, %c4, %c0_87, %c0_88] : memref<1x8x8x64xf32, #tpu.memory_space<vmem>>, vector<1x1x8x64xf32>
    %149 = vector.shape_cast %148 : vector<1x1x8x64xf32> to vector<8x64xf32>
    %150 = vector.shape_cast %147 : vector<8x64xf32> to vector<1x1x8x64xf32>
    tpu.vector_store %arg4[%c0_86, %c4, %c0_87, %c0_88], %150 {strides = array<i32>} : memref<1x8x8x64xf32, #tpu.memory_space<vmem>>, vector<1x1x8x64xf32>,
    %151 = vector.extract_strided_slice %130 {offsets = [32, 0], sizes = [16, 128], strides = [1, 1]} : vector<64x128xf32> to vector<16x128xf32>
    %152 = vector.extract_strided_slice %130 {offsets = [48, 0], sizes = [16, 128], strides = [1, 1]} : vector<64x128xf32> to vector<16x128xf32>
    %153 = arith.maximumf %151, %152 : vector<16x128xf32>
    %154 = vector.extract_strided_slice %153 {offsets = [0, 0], sizes = [8, 128], strides = [1, 1]} : vector<16x128xf32> to vector<8x128xf32>
    %155 = vector.extract_strided_slice %153 {offsets = [8, 0], sizes = [8, 128], strides = [1, 1]} : vector<16x128xf32> to vector<8x128xf32>
    %156 = arith.maximumf %154, %155 : vector<8x128xf32>
    %157 = vector.extract_strided_slice %156 {offsets = [0, 0], sizes = [8, 64], strides = [1, 1]} : vector<8x128xf32> to vector<8x64xf32>
    %158 = vector.extract_strided_slice %156 {offsets = [0, 64], sizes = [8, 64], strides = [1, 1]} : vector<8x128xf32> to vector<8x64xf32>
    %159 = arith.maximumf %157, %158 : vector<8x64xf32>
    %c0_89 = arith.constant 0 : index
    %c0_90 = arith.constant 0 : index
    %160 = vector.load %arg3[%c0_89, %c0_90] : memref<1x64xf32, #tpu.memory_space<vmem>>, vector<1x64xf32>
    %161 = vector.broadcast %160 : vector<1x64xf32> to vector<8x64xf32>
    %162 = arith.addf %159, %161 : vector<8x64xf32>
    %cst_91 = arith.constant 0.000000e+00 : f32
    %163 = vector.broadcast %cst_91 : f32 to vector<8x64xf32>
    %164 = arith.cmpf oge, %162, %163 : vector<8x64xf32>
    %cst_92 = arith.constant 3.000000e-01 : f32
    %165 = vector.broadcast %cst_92 : f32 to vector<8x64xf32>
    %166 = arith.mulf %162, %165 : vector<8x64xf32>
    %167 = arith.select %164, %162, %166 : vector<8x64xi1>, vector<8x64xf32>
    %c0_93 = arith.constant 0 : index
    %c5 = arith.constant 5 : index
    %c0_94 = arith.constant 0 : index
    %c0_95 = arith.constant 0 : index
    %168 = vector.load %arg4[%c0_93, %c5, %c0_94, %c0_95] : memref<1x8x8x64xf32, #tpu.memory_space<vmem>>, vector<1x1x8x64xf32>
    %169 = vector.shape_cast %168 : vector<1x1x8x64xf32> to vector<8x64xf32>
    %170 = vector.shape_cast %167 : vector<8x64xf32> to vector<1x1x8x64xf32>
    tpu.vector_store %arg4[%c0_93, %c5, %c0_94, %c0_95], %170 {strides = array<i32>} : memref<1x8x8x64xf32, #tpu.memory_space<vmem>>, vector<1x1x8x64xf32>,
    %c0_96 = arith.constant 0 : index
    %c192 = arith.constant 192 : index
    %c0_97 = arith.constant 0 : index
    %171 = vector.load %arg1[%c0_96, %c192, %c0_97] : memref<1x288x192xbf16, #tpu.memory_space<vmem>>, vector<1x64x192xbf16>
    %172 = vector.shape_cast %171 : vector<1x64x192xbf16> to vector<64x192xbf16>
    %c0_98 = arith.constant 0 : index
    %c0_99 = arith.constant 0 : index
    %c0_100 = arith.constant 0 : index
    %173 = vector.load %arg2[%c0_98, %c0_99, %c0_100] : memref<3x192x128xbf16, #tpu.memory_space<vmem>>, vector<1x192x128xbf16>
    %174 = vector.shape_cast %173 : vector<1x192x128xbf16> to vector<192x128xbf16>
    %cst_101 = arith.constant dense<0.000000e+00> : vector<64x128xf32>
    %175 = tpu.matmul %172, %174, %cst_101 {dimension_numbers = #tpu.dot_dimension_numbers<[1], [0], [0], [1], [0, 0, 1, 1], [], []>} : vector<64x192xbf16>, vector<192x128xbf16>, vector<64x128xf32> -> vector<64x128xf32>
    %c0_102 = arith.constant 0 : index
    %c208 = arith.constant 208 : index
    %c0_103 = arith.constant 0 : index
    %176 = vector.load %arg1[%c0_102, %c208, %c0_103] : memref<1x288x192xbf16, #tpu.memory_space<vmem>>, vector<1x64x192xbf16>
    %177 = vector.shape_cast %176 : vector<1x64x192xbf16> to vector<64x192xbf16>
    %c1_104 = arith.constant 1 : index
    %c0_105 = arith.constant 0 : index
    %c0_106 = arith.constant 0 : index
    %178 = vector.load %arg2[%c1_104, %c0_105, %c0_106] : memref<3x192x128xbf16, #tpu.memory_space<vmem>>, vector<1x192x128xbf16>
    %179 = vector.shape_cast %178 : vector<1x192x128xbf16> to vector<192x128xbf16>
    %cst_107 = arith.constant dense<0.000000e+00> : vector<64x128xf32>
    %180 = tpu.matmul %177, %179, %cst_107 {dimension_numbers = #tpu.dot_dimension_numbers<[1], [0], [0], [1], [0, 0, 1, 1], [], []>} : vector<64x192xbf16>, vector<192x128xbf16>, vector<64x128xf32> -> vector<64x128xf32>
    %181 = arith.addf %175, %180 : vector<64x128xf32>
    %c0_108 = arith.constant 0 : index
    %c224 = arith.constant 224 : index
    %c0_109 = arith.constant 0 : index
    %182 = vector.load %arg1[%c0_108, %c224, %c0_109] : memref<1x288x192xbf16, #tpu.memory_space<vmem>>, vector<1x64x192xbf16>
    %183 = vector.shape_cast %182 : vector<1x64x192xbf16> to vector<64x192xbf16>
    %c2_110 = arith.constant 2 : index
    %c0_111 = arith.constant 0 : index
    %c0_112 = arith.constant 0 : index
    %184 = vector.load %arg2[%c2_110, %c0_111, %c0_112] : memref<3x192x128xbf16, #tpu.memory_space<vmem>>, vector<1x192x128xbf16>
    %185 = vector.shape_cast %184 : vector<1x192x128xbf16> to vector<192x128xbf16>
    %cst_113 = arith.constant dense<0.000000e+00> : vector<64x128xf32>
    %186 = tpu.matmul %183, %185, %cst_113 {dimension_numbers = #tpu.dot_dimension_numbers<[1], [0], [0], [1], [0, 0, 1, 1], [], []>} : vector<64x192xbf16>, vector<192x128xbf16>, vector<64x128xf32> -> vector<64x128xf32>
    %187 = arith.addf %181, %186 : vector<64x128xf32>
    %188 = vector.extract_strided_slice %187 {offsets = [0, 0], sizes = [16, 128], strides = [1, 1]} : vector<64x128xf32> to vector<16x128xf32>
    %189 = vector.extract_strided_slice %187 {offsets = [16, 0], sizes = [16, 128], strides = [1, 1]} : vector<64x128xf32> to vector<16x128xf32>
    %190 = arith.maximumf %188, %189 : vector<16x128xf32>
    %191 = vector.extract_strided_slice %190 {offsets = [0, 0], sizes = [8, 128], strides = [1, 1]} : vector<16x128xf32> to vector<8x128xf32>
    %192 = vector.extract_strided_slice %190 {offsets = [8, 0], sizes = [8, 128], strides = [1, 1]} : vector<16x128xf32> to vector<8x128xf32>
    %193 = arith.maximumf %191, %192 : vector<8x128xf32>
    %194 = vector.extract_strided_slice %193 {offsets = [0, 0], sizes = [8, 64], strides = [1, 1]} : vector<8x128xf32> to vector<8x64xf32>
    %195 = vector.extract_strided_slice %193 {offsets = [0, 64], sizes = [8, 64], strides = [1, 1]} : vector<8x128xf32> to vector<8x64xf32>
    %196 = arith.maximumf %194, %195 : vector<8x64xf32>
    %c0_114 = arith.constant 0 : index
    %c0_115 = arith.constant 0 : index
    %197 = vector.load %arg3[%c0_114, %c0_115] : memref<1x64xf32, #tpu.memory_space<vmem>>, vector<1x64xf32>
    %198 = vector.broadcast %197 : vector<1x64xf32> to vector<8x64xf32>
    %199 = arith.addf %196, %198 : vector<8x64xf32>
    %cst_116 = arith.constant 0.000000e+00 : f32
    %200 = vector.broadcast %cst_116 : f32 to vector<8x64xf32>
    %201 = arith.cmpf oge, %199, %200 : vector<8x64xf32>
    %cst_117 = arith.constant 3.000000e-01 : f32
    %202 = vector.broadcast %cst_117 : f32 to vector<8x64xf32>
    %203 = arith.mulf %199, %202 : vector<8x64xf32>
    %204 = arith.select %201, %199, %203 : vector<8x64xi1>, vector<8x64xf32>
    %c0_118 = arith.constant 0 : index
    %c6 = arith.constant 6 : index
    %c0_119 = arith.constant 0 : index
    %c0_120 = arith.constant 0 : index
    %205 = vector.load %arg4[%c0_118, %c6, %c0_119, %c0_120] : memref<1x8x8x64xf32, #tpu.memory_space<vmem>>, vector<1x1x8x64xf32>
    %206 = vector.shape_cast %205 : vector<1x1x8x64xf32> to vector<8x64xf32>
    %207 = vector.shape_cast %204 : vector<8x64xf32> to vector<1x1x8x64xf32>
    tpu.vector_store %arg4[%c0_118, %c6, %c0_119, %c0_120], %207 {strides = array<i32>} : memref<1x8x8x64xf32, #tpu.memory_space<vmem>>, vector<1x1x8x64xf32>,
    %208 = vector.extract_strided_slice %187 {offsets = [32, 0], sizes = [16, 128], strides = [1, 1]} : vector<64x128xf32> to vector<16x128xf32>
    %209 = vector.extract_strided_slice %187 {offsets = [48, 0], sizes = [16, 128], strides = [1, 1]} : vector<64x128xf32> to vector<16x128xf32>
    %210 = arith.maximumf %208, %209 : vector<16x128xf32>
    %211 = vector.extract_strided_slice %210 {offsets = [0, 0], sizes = [8, 128], strides = [1, 1]} : vector<16x128xf32> to vector<8x128xf32>
    %212 = vector.extract_strided_slice %210 {offsets = [8, 0], sizes = [8, 128], strides = [1, 1]} : vector<16x128xf32> to vector<8x128xf32>
    %213 = arith.maximumf %211, %212 : vector<8x128xf32>
    %214 = vector.extract_strided_slice %213 {offsets = [0, 0], sizes = [8, 64], strides = [1, 1]} : vector<8x128xf32> to vector<8x64xf32>
    %215 = vector.extract_strided_slice %213 {offsets = [0, 64], sizes = [8, 64], strides = [1, 1]} : vector<8x128xf32> to vector<8x64xf32>
    %216 = arith.maximumf %214, %215 : vector<8x64xf32>
    %c0_121 = arith.constant 0 : index
    %c0_122 = arith.constant 0 : index
    %217 = vector.load %arg3[%c0_121, %c0_122] : memref<1x64xf32, #tpu.memory_space<vmem>>, vector<1x64xf32>
    %218 = vector.broadcast %217 : vector<1x64xf32> to vector<8x64xf32>
    %219 = arith.addf %216, %218 : vector<8x64xf32>
    %cst_123 = arith.constant 0.000000e+00 : f32
    %220 = vector.broadcast %cst_123 : f32 to vector<8x64xf32>
    %221 = arith.cmpf oge, %219, %220 : vector<8x64xf32>
    %cst_124 = arith.constant 3.000000e-01 : f32
    %222 = vector.broadcast %cst_124 : f32 to vector<8x64xf32>
    %223 = arith.mulf %219, %222 : vector<8x64xf32>
    %224 = arith.select %221, %219, %223 : vector<8x64xi1>, vector<8x64xf32>
    %c0_125 = arith.constant 0 : index
    %c7 = arith.constant 7 : index
    %c0_126 = arith.constant 0 : index
    %c0_127 = arith.constant 0 : index
    %225 = vector.load %arg4[%c0_125, %c7, %c0_126, %c0_127] : memref<1x8x8x64xf32, #tpu.memory_space<vmem>>, vector<1x1x8x64xf32>
    %226 = vector.shape_cast %225 : vector<1x1x8x64xf32> to vector<8x64xf32>
    %227 = vector.shape_cast %224 : vector<8x64xf32> to vector<1x1x8x64xf32>
    tpu.vector_store %arg4[%c0_125, %c7, %c0_126, %c0_127], %227 {strides = array<i32>} : memref<1x8x8x64xf32, #tpu.memory_space<vmem>>, vector<1x1x8x64xf32>,
    return
  }
  func.func @transform_0(%arg0: i32) -> (i32, i32, i32) {
    %c0_i32 = arith.constant 0 : i32
    %c0_i32_0 = arith.constant 0 : i32
    %c0_i32_1 = arith.constant 0 : i32
    return %arg0, %c0_i32, %c0_i32_0 : i32, i32, i32
  }
  func.func @transform_1(%arg0: i32) -> (i32, i32, i32) {
    %c0_i32 = arith.constant 0 : i32
    %c0_i32_0 = arith.constant 0 : i32
    %c0_i32_1 = arith.constant 0 : i32
    %c0_i32_2 = arith.constant 0 : i32
    return %c0_i32, %c0_i32_0, %c0_i32_1 : i32, i32, i32
  }
  func.func @transform_2(%arg0: i32) -> (i32, i32) {
    %c0_i32 = arith.constant 0 : i32
    %c0_i32_0 = arith.constant 0 : i32
    %c0_i32_1 = arith.constant 0 : i32
    return %c0_i32, %c0_i32_0 : i32, i32
  }
  func.func @transform_3(%arg0: i32) -> (i32, i32, i32, i32) {
    %c0_i32 = arith.constant 0 : i32
    %c0_i32_0 = arith.constant 0 : i32
    %c0_i32_1 = arith.constant 0 : i32
    %c0_i32_2 = arith.constant 0 : i32
    return %arg0, %c0_i32, %c0_i32_0, %c0_i32_1 : i32, i32, i32, i32
  }
}

</mosaic_0001>

<bundles_post_ra>
// kernel: tile.8
= control target key start
LH: loop header
LB: loop body
LE: loop exit
PB: predicated region body
PF: predicated region fallthrough
CT: control target
= control target key end

     0   :  { %s22_s0 = inlined_call_operand.vmem [shape: f32[8], index: 0, kind: input, shape index: {}]   ;;  %s23_s1 = inlined_call_operand.vmem [shape: f32[8,8], index: 1, kind: output, shape index: {}]  }
   0x1   :  { %v4_v0 = vld [vmem:[%s22_s0] ss:$0 sm:$0xff] }
   0x2   :  { %5 = vst [vmem:[%s23_s1] sm:$0xff] %v4_v0 }

// kernel: tile.9
= control target key start
LH: loop header
LB: loop body
LE: loop exit
PB: predicated region body
PF: predicated region fallthrough
CT: control target
= control target key end

     0   :  { %s69_s10 = smov 56   ;;  %s70_s11 = smov 40   ;;  %vm3_vm0 = vcmask 64512   ;;  %vm9_vm1 = vcmask 523712   ;;  %vm15_vm2 = vcmask 458112   ;;  %vm21_vm3 = vcmask 392512   ;;  %s113_s0 = inlined_call_operand.vmem [shape: f32[8,8], index: 0, kind: input, shape index: {}]   ;;  %s114_s1 = inlined_call_operand.vmem [shape: f32[1,64], index: 1, kind: output, shape index: {}]  }
   0x1   :  { %v55_v0 = vld [vmem:[%s113_s0 + $0x7] sm:$0x1]   ;;  %v57_v1 = vld [vmem:[%s113_s0 + $0x5] sm:$0x1]   ;;  %v56_v2 = vld [vmem:[%s113_s0 + $0x6] sm:$0x1]  }
   0x2   :  { %7 = vrot.lane.b32.xlu0 %v55_v0, %s69_s10  ;;  %19 = vrot.lane.b32.xlu1 %v57_v1, %s70_s11  ;;  %v58_v3 = vld [vmem:[%s113_s0 + $0x4] sm:$0x1]   ;;  %v2_v4 = vld [vmem:[%s113_s0] sm:$0x1]   ;;  %s71_s18 = smov 48   ;;  %s72_s19 = smov 32  }
   0x3   :  { %4 = vst.msk [vmem:[#allocation0] sm:$0x1] %vm3_vm0, %v2_v4   ;;  %v59_v5 = vld [vmem:[%s113_s0 + $0x3] sm:$0x1]   ;;  %v60_v6 = vld [vmem:[%s113_s0 + $0x2] sm:$0x1]  }
   0x4   :  { %s73_s24 = smov 24   ;;  %s74_s25 = smov 16   ;;  %v61_v7 = vld [vmem:[%s113_s0 + $0x1] sm:$0x1]   ;;  %vm27_vm4 = vcmask 326912   ;;  %vm33_vm5 = vcmask 261312  }
   0x5   :  { %s75_s0 = smov 8   ;;  %vm39_vm6 = vcmask 195712   ;;  %vm45_vm7 = vcmask 130112  }
   0x6   :  { %13 = vrot.lane.b32.xlu0 %v56_v2, %s71_s18  ;;  %25 = vrot.lane.b32.xlu1 %v58_v3, %s72_s19 }
   0xa   :  { %31 = vrot.lane.b32.xlu0 %v59_v5, %s73_s24  ;;  %37 = vrot.lane.b32.xlu1 %v60_v6, %s74_s25 }
   0xe   :  { %43 = vrot.lane.b32.xlu0 %v61_v7, %s75_s0 }
  0x74   :  { %v8_v8 = vpop.permute.xlu0 %7   ;;  %v20_v9 = vpop.permute.xlu1 %19  }
  0x75   :  { %10 = vst.msk [vmem:[#allocation0] sm:$0x1] %vm9_vm1, %v8_v8  }
  0x78   :  { %v14_v10 = vpop.permute.xlu0 %13   ;;  %v26_v11 = vpop.permute.xlu1 %25  }
  0x79   :  { %16 = vst.msk [vmem:[#allocation0] sm:$0x1] %vm15_vm2, %v14_v10  }
  0x7a   :  { %22 = vst.msk [vmem:[#allocation0] sm:$0x1] %vm21_vm3, %v20_v9  }
  0x7b   :  { %28 = vst.msk [vmem:[#allocation0] sm:$0x1] %vm27_vm4, %v26_v11  }
  0x7c   :  { %v32_v12 = vpop.permute.xlu0 %31   ;;  %v38_v13 = vpop.permute.xlu1 %37  }
  0x7d   :  { %34 = vst.msk [vmem:[#allocation0] sm:$0x1] %vm33_vm5, %v32_v12  }
  0x7e   :  { %40 = vst.msk [vmem:[#allocation0] sm:$0x1] %vm39_vm6, %v38_v13  }
  0x80   :  { %v44_v14 = vpop.permute.xlu0 %43  }
  0x81   :  { %46 = vst.msk [vmem:[#allocation0] sm:$0x1] %vm45_vm7, %v44_v14  }
  0x88   :  { %v51_v15 = vld [vmem:[#allocation0] sm:$0x1] }
  0x89   :  { %54 = vst [vmem:[%s114_s1] sm:$0x1] %v51_v15 }

// kernel: conv3d_act_mp.1
= control target key start
LH: loop header
LB: loop body
LE: loop exit
PB: predicated region body
PF: predicated region fallthrough
CT: control target
= control target key end

     0   :  { %s3586_s12 = smov 0   ;;  %s4574_s0 = inlined_call_operand.vmem [shape: bf16[2,288,192], index: 0, kind: input, shape index: {}]   ;;  %s4575_s1 = inlined_call_operand.vmem [shape: bf16[3,192,128], index: 1, kind: input, shape index: {}]   ;;  %s4576_s2 = inlined_call_operand.vmem [shape: f32[1,64], index: 2, kind: input, shape index: {}]   ;;  %s4577_s3 = inlined_call_operand.vmem [shape: f32[2,8,8,64], index: 3, kind: output, shape index: {}]  }
   0x1 LB: > { %s2865_s13 = sadd.s32 4294967295, %s3562_s12   ;;  %p2869_p0 = scmp.ge.s32.totalorder %s3562_s12, 1  ;;  %s3562_s12 = sphi %s3586_s12, %s13_s12  }
   0x2   : > { %p137_p1 = scmp.lt.s32.totalorder %s3562_s12, 3 }
   0x4   : > { %p138_p2 = pnand %p2869_p0, %p137_p1 }
   0x5   : > { %p161_p3 = scmp.lt.s32.totalorder (!%p138_p2), %s2865_s13, 1  ;;  %s3565_s16 = smov (!%p138_p2), 64  }
   0x6   : > { %141 = sbr.rel (%p138_p2) target bundleno = 652 (0x28c), region = 32 }
   0xb   : > { %v3358_v0 = vld [vmem:[%s4575_s1 + $0x98] sm:$0xff]   ;;  %v3564_v1 = vmov 0   ;;  %v3360_v3 = vld [vmem:[%s4575_s1 + $0x90] sm:$0xff]   ;;  %v3362_v5 = vld [vmem:[%s4575_s1 + $0x88] sm:$0xff]   ;;  %s4579_s13 = smov (!%p161_p3, %s2865_s13), 1  ;;  %vm339_vm0 = vcmask 523264  }
   0xc   : > { %352 = vmatprep.subr.bf16.mxu0 %v3564_v1  ;;  %501 = vmatprep.subr.bf16.mxu1 %v3564_v1  ;;  %v3359_v2 = vld [vmem:[%s4575_s1 + $0x38] sm:$0xff]   ;;  %v3361_v4 = vld [vmem:[%s4575_s1 + $0x30] sm:$0xff]   ;;  %v3363_v6 = vld [vmem:[%s4575_s1 + $0x28] sm:$0xff]   ;;  %s3347_s9 = smul.u32 288, %s4579_s13  ;;  %s3346_s19 = sshll.u32 %s4579_s13, 6 }
   0xd   : > { %353 = vmatpush1.bf16.msra.mxu0 %v3358_v0  ;;  %502 = vmatpush1.bf16.msra.mxu1 %v3359_v2  ;;  %v3364_v7 = vld [vmem:[%s4575_s1 + $0x80] sm:$0xff]   ;;  %v3366_v9 = vld [vmem:[%s4575_s1 + $0x78] sm:$0xff]   ;;  %v3368_v11 = vld [vmem:[%s4575_s1 + $0x70] sm:$0xff]   ;;  %s4509_s22 = scalar_lea.vmem %s4577_s3, %s3346_s19 }
   0xe   : > { %354 = vmatprep.subr.bf16.mxu0 %v3564_v1  ;;  %503 = vmatprep.subr.bf16.mxu1 %v3564_v1  ;;  %v3365_v8 = vld [vmem:[%s4575_s1 + $0x20] sm:$0xff]   ;;  %v3367_v10 = vld [vmem:[%s4575_s1 + $0x18] sm:$0xff]   ;;  %v3369_v12 = vld [vmem:[%s4575_s1 + $0x10] sm:$0xff]   ;;  %s3655_s18 = scalar_lea.vmem %s4574_s0, %s3347_s9 }
   0xf   : > { %v3370_v13 = vld [vmem:[%s4575_s1 + $0x68] sm:$0xff]   ;;  %v3384_v15 = vld [vmem:[%s3655_s18 + $0x14] ss:$8 sps:$4 sm:$0xff]   ;;  %v3372_v16 = vld [vmem:[%s4575_s1 + $0x60] sm:$0xff]  }
  0x10   : > { %v3371_v14 = vld [vmem:[%s4575_s1 + $0x8] sm:$0xff]   ;;  %v3373_v18 = vld [vmem:[%s4575_s1] sm:$0xff]   ;;  %2917 = vmatprep.mubr.msk.bf16.mxu0 %vm339_vm0, %v3384_v15  ;;  %v3374_v19 = vld [vmem:[%s4575_s1 + $0xb8] sm:$0xff]  }
  0x11   : > { %355 = vmatpush1.bf16.msra.mxu0 %v3360_v3  ;;  %504 = vmatpush1.bf16.msra.mxu1 %v3361_v4  ;;  %v3387_v17 = vld [vmem:[%s3655_s18 + $0x4] ss:$8 sps:$4 sm:$0xff]   ;;  %v3375_v20 = vld [vmem:[%s4575_s1 + $0x58] sm:$0xff]   ;;  %v3376_v21 = vld [vmem:[%s4575_s1 + $0xb0] sm:$0xff]  }
  0x12   : > { %356 = vmatprep.subr.bf16.mxu0 %v3564_v1  ;;  %505 = vmatprep.subr.bf16.mxu1 %v3564_v1  ;;  %v3377_v22 = vld [vmem:[%s4575_s1 + $0x50] sm:$0xff]   ;;  %v3378_v23 = vld [vmem:[%s4575_s1 + $0xa8] sm:$0xff]   ;;  %v3380_v25 = vld [vmem:[%s4575_s1 + $0xa0] sm:$0xff]  }
  0x13   : > { %2935 = vmatprep.mubr.msk.bf16.mxu1 %vm339_vm0, %v3387_v17  ;;  %v3379_v24 = vld [vmem:[%s4575_s1 + $0x48] sm:$0xff]   ;;  %v3381_v26 = vld [vmem:[%s4575_s1 + $0x40] sm:$0xff]   ;;  %v3382_v27 = vld [vmem:[%s3655_s18 + $0x10] ss:$8 sps:$4 sm:$0xff]  }
  0x14   : > { %v3385_v28 = vld [vmem:[%s3655_s18] ss:$8 sps:$4 sm:$0xff]   ;;  %v3388_v29 = vld [vmem:[%s4575_s1 + $0xf8] sm:$0xff]   ;;  %v3717_v31 = vld [vmem:[%s3655_s18 + $0x24] ss:$8 sps:$4 sm:$0xff]  }
  0x15   : > { %357 = vmatpush1.bf16.msra.mxu0 %v3362_v5  ;;  %506 = vmatpush1.bf16.msra.mxu1 %v3363_v6  ;;  %v3389_v30 = vld [vmem:[%s4575_s1 + $0x98] sm:$0xff]   ;;  %v3390_v32 = vld [vmem:[%s4575_s1 + $0xf0] sm:$0xff]   ;;  %v3730_v34 = vld [vmem:[%s3655_s18 + $0x20] ss:$8 sps:$4 sm:$0xff]  }
  0x16   : > { %358 = vmatprep.subr.bf16.mxu0 %v3564_v1  ;;  %507 = vmatprep.subr.bf16.mxu1 %v3564_v1  ;;  %v3391_v33 = vld [vmem:[%s4575_s1 + $0x90] sm:$0xff]   ;;  %v3392_v35 = vld [vmem:[%s4575_s1 + $0xe8] sm:$0xff]   ;;  %v3394_v38 = vld [vmem:[%s4575_s1 + $0xe0] sm:$0xff]  }
  0x17   : > { %v3393_v36 = vld [vmem:[%s4575_s1 + $0x88] sm:$0xff]   ;;  %v3742_v37 = vld [vmem:[%s3655_s18 + $0x34] ss:$8 sps:$4 sm:$0xff]   ;;  %v3395_v39 = vld [vmem:[%s4575_s1 + $0x80] sm:$0xff]  }
  0x18   : > { %v3756_v40 = vld [vmem:[%s3655_s18 + $0x30] ss:$8 sps:$4 sm:$0xff]   ;;  %v3769_v43 = vld [vmem:[%s3655_s18 + $0x44] ss:$8 sps:$4 sm:$0xff]   ;;  %v3784_v46 = vld [vmem:[%s3655_s18 + $0x40] ss:$8 sps:$4 sm:$0xff]  }
  0x19   : > { %359 = vmatpush1.bf16.msra.mxu0 %v3364_v7  ;;  %508 = vmatpush1.bf16.msra.mxu1 %v3365_v8  ;;  %v3396_v41 = vld [vmem:[%s4575_s1 + $0xd8] sm:$0xff]   ;;  %v3401_v44 = vld [vmem:[%s4575_s1 + $0xd0] sm:$0xff]   ;;  %v3403_v47 = vld [vmem:[%s4575_s1 + $0xc8] sm:$0xff]  }
  0x1a   : > { %360 = vmatprep.subr.bf16.mxu0 %v3564_v1  ;;  %509 = vmatprep.subr.bf16.mxu1 %v3564_v1  ;;  %v3397_v42 = vld [vmem:[%s4575_s1 + $0x78] sm:$0xff]   ;;  %v3402_v45 = vld [vmem:[%s4575_s1 + $0x70] sm:$0xff]   ;;  %v3404_v48 = vld [vmem:[%s4575_s1 + $0x68] sm:$0xff]  }
  0x1b   : > { %v3798_v49 = vld [vmem:[%s3655_s18 + $0x54] ss:$8 sps:$4 sm:$0xff]   ;;  %v3408_v50 = vld [vmem:[%s4575_s1 + $0xc0] sm:$0xff]   ;;  %v3417_v56 = vld [vmem:[%s4575_s1 + $0x108] sm:$0xff]  }
  0x1c   : > { %v3409_v51 = vld [vmem:[%s4575_s1 + $0x60] sm:$0xff]   ;;  %v3410_v52 = vld [vmem:[%s4575_s1 + $0x118] sm:$0xff]   ;;  %v3415_v54 = vld [vmem:[%s4575_s1 + $0x110] sm:$0xff]  }
  0x1d   : > { %361 = vmatpush1.bf16.msra.mxu0 %v3366_v9  ;;  %510 = vmatpush1.bf16.msra.mxu1 %v3367_v10  ;;  %v3411_v53 = vld [vmem:[%s4575_s1 + $0xb8] sm:$0xff]   ;;  %v3416_v55 = vld [vmem:[%s4575_s1 + $0xb0] sm:$0xff]   ;;  %v3418_v57 = vld [vmem:[%s4575_s1 + $0xa8] sm:$0xff]  }
  0x1e   : > { %362 = vmatprep.subr.bf16.mxu0 %v3564_v1  ;;  %511 = vmatprep.subr.bf16.mxu1 %v3564_v1  ;;  %v3419_v58 = vld [vmem:[%s4575_s1 + $0x100] sm:$0xff]   ;;  %v3846_v60 = vld [vmem:[%s3655_s18 + $0x50] ss:$8 sps:$4 sm:$0xff]   ;;  %v3428_v3 = vld [vmem:[%s4575_s1 + $0x28] sm:$0xff]  }
  0x1f   : > { %v3420_v59 = vld [vmem:[%s4575_s1 + $0xa0] sm:$0xff]   ;;  %v3424_v61 = vld [vmem:[%s4575_s1 + $0x38] sm:$0xff]   ;;  %v3426_v0 = vld [vmem:[%s4575_s1 + $0x30] sm:$0xff]  }
  0x20   : > { %v3425_v62 = vld [vmem:[%s4575_s1 + $0xf8] sm:$0xff]   ;;  %v3858_v63 = vld [vmem:[%s3655_s18 + $0x64] ss:$8 sps:$4 sm:$0xff]   ;;  %v3427_v2 = vld [vmem:[%s4575_s1 + $0xf0] sm:$0xff]  }
  0x21   : > { %363 = vmatpush1.bf16.msra.mxu0 %v3368_v11  ;;  %512 = vmatpush1.bf16.msra.mxu1 %v3369_v12  ;;  %v3429_v4 = vld [vmem:[%s4575_s1 + $0xe8] sm:$0xff]   ;;  %v3886_v6 = vld [vmem:[%s3655_s18 + $0x74] ss:$8 sps:$4 sm:$0xff]   ;;  %v3430_v7 = vld [vmem:[%s4575_s1 + $0x20] sm:$0xff]  }
  0x22   : > { %364 = vmatprep.subr.bf16.mxu0 %v3564_v1  ;;  %513 = vmatprep.subr.bf16.mxu1 %v3564_v1  ;;  %v3882_v5 = vld [vmem:[%s3655_s18 + $0x60] ss:$8 sps:$4 sm:$0xff]   ;;  %v3432_v9 = vld [vmem:[%s4575_s1 + $0x18] sm:$0xff]   ;;  %v3914_v12 = vld [vmem:[%s3655_s18 + $0x84] ss:$8 sps:$4 sm:$0xff]  }
  0x23   : > { %v3431_v8 = vld [vmem:[%s4575_s1 + $0xe0] sm:$0xff]   ;;  %v3433_v10 = vld [vmem:[%s4575_s1 + $0xd8] sm:$0xff]  }
  0x24   : > { %v3910_v11 = vld [vmem:[%s3655_s18 + $0x70] ss:$8 sps:$4 sm:$0xff]   ;;  %v3938_v17 = vld [vmem:[%s3655_s18 + $0x80] ss:$8 sps:$4 sm:$0xff]  }
  0x25   : > { %365 = vmatpush1.bf16.msra.mxu0 %v3370_v13  ;;  %514 = vmatpush1.bf16.msra.mxu1 %v3371_v14  ;;  %v3437_v13 = vld [vmem:[%s4575_s1 + $0x10] sm:$0xff]  }
  0x26   : > { %366 = vmatprep.subr.bf16.mxu0 %v3564_v1  ;;  %515 = vmatprep.subr.bf16.mxu1 %v3564_v1  ;;  %v3438_v14 = vld [vmem:[%s4575_s1 + $0xd0] sm:$0xff]  }
  0x29   : > { %367 = vmatpush1.bf16.msra.mxu0 %v3372_v16  ;;  %516 = vmatpush1.bf16.msra.mxu1 %v3373_v18  ;;  %v3440_v16 = vld [vmem:[%s4575_s1 + $0xc8] sm:$0xff]   ;;  %v3444_v18 = vld [vmem:[%s4575_s1] sm:$0xff]  }
  0x2a   : > { %376 = vmatprep.subr.bf16.mxu0 %v3564_v1  ;;  %525 = vmatprep.subr.bf16.mxu1 %v3564_v1 }
  0x2d   : > { %377 = vmatpush2.bf16.msra.mxu0 %v3374_v19  ;;  %526 = vmatpush2.bf16.msra.mxu1 %v3375_v20  ;;  %v3445_v19 = vld [vmem:[%s4575_s1 + $0xc0] sm:$0xff]   ;;  %v3446_v20 = vld [vmem:[%s4575_s1 + $0x58] sm:$0xff]  }
  0x2e   : > { %378 = vmatprep.subr.bf16.mxu0 %v3564_v1  ;;  %527 = vmatprep.subr.bf16.mxu1 %v3564_v1 }
  0x31   : > { %379 = vmatpush2.bf16.msra.mxu0 %v3376_v21  ;;  %528 = vmatpush2.bf16.msra.mxu1 %v3377_v22  ;;  %v3447_v21 = vld [vmem:[%s4575_s1 + $0x118] sm:$0xff]   ;;  %v3451_v22 = vld [vmem:[%s4575_s1 + $0x50] sm:$0xff]  }
  0x32   : > { %380 = vmatprep.subr.bf16.mxu0 %v3564_v1  ;;  %529 = vmatprep.subr.bf16.mxu1 %v3564_v1 }
  0x35   : > { %381 = vmatpush2.bf16.msra.mxu0 %v3378_v23  ;;  %530 = vmatpush2.bf16.msra.mxu1 %v3379_v24  ;;  %v3452_v23 = vld [vmem:[%s4575_s1 + $0x110] sm:$0xff]   ;;  %v3453_v24 = vld [vmem:[%s4575_s1 + $0x48] sm:$0xff]  }
  0x36   : > { %382 = vmatprep.subr.bf16.mxu0 %v3564_v1  ;;  %531 = vmatprep.subr.bf16.mxu1 %v3564_v1 }
  0x39   : > { %383 = vmatpush2.bf16.msra.mxu0 %v3380_v25  ;;  %532 = vmatpush2.bf16.msra.mxu1 %v3381_v26  ;;  %v3454_v25 = vld [vmem:[%s4575_s1 + $0x108] sm:$0xff]   ;;  %v3455_v26 = vld [vmem:[%s4575_s1 + $0x40] sm:$0xff]  }
  0x3a   : > { %719 = vmatprep.subr.bf16.mxu0 %v3564_v1  ;;  %1011 = vmatprep.subr.bf16.mxu1 %v3564_v1 }
  0x3c   : > { %385 = vmatmul.mubr.bf16.vlgmr.msra.gmra.mxu0 %v3382_v27  ;;  %534 = vmatmul.mubr.bf16.vlgmr.msra.gmra.mxu1 %v3385_v28  ;;  %v3457_v28 = vld [vmem:[%s4575_s1 + $0x98] sm:$0xff]  }
  0x3d   : > { %720 = vmatpush1.bf16.msra.mxu0 %v3388_v29  ;;  %1012 = vmatpush1.bf16.msra.mxu1 %v3389_v30  ;;  %v3458_v29 = vld [vmem:[%s4575_s1 + $0x38] sm:$0xff]   ;;  %v3459_v30 = vld [vmem:[%s4575_s1 + $0x90] sm:$0xff]  }
  0x3e   : > { %721 = vmatprep.subr.bf16.mxu0 %v3564_v1  ;;  %1013 = vmatprep.subr.bf16.mxu1 %v3564_v1 }
  0x3f   : > { %2918 = vmatprep.mubr.msk.bf16.mxu0 %vm339_vm0, %v3717_v31  ;;  %2936 = vmatprep.mubr.msk.bf16.mxu1 %vm339_vm0, %v3384_v15  ;;  %v3439_v15 = vld [vmem:[%s4575_s1 + $0x8] sm:$0xff]  }
  0x41   : > { %722 = vmatpush1.bf16.msra.mxu0 %v3390_v32  ;;  %1014 = vmatpush1.bf16.msra.mxu1 %v3391_v33  ;;  %v3461_v32 = vld [vmem:[%s4575_s1 + $0x88] sm:$0xff]  }
  0x42   : > { %723 = vmatprep.subr.bf16.mxu0 %v3564_v1  ;;  %1015 = vmatprep.subr.bf16.mxu1 %v3564_v1  ;;  %v3462_v33 = vld [vmem:[%s4575_s1 + $0x28] sm:$0xff]  }
  0x44   : > { %393 = vmatmul.mubr.bf16.gmra.mxu0 %v3730_v34  ;;  %542 = vmatmul.mubr.bf16.gmra.mxu1 %v3382_v27  ;;  %v3456_v27 = vld [vmem:[%s4575_s1 + $0x100] sm:$0xff]  }
  0x45   : > { %724 = vmatpush1.bf16.msra.mxu0 %v3392_v35  ;;  %1016 = vmatpush1.bf16.msra.mxu1 %v3393_v36  ;;  %v3464_v35 = vld [vmem:[%s4575_s1 + $0x20] sm:$0xff]   ;;  %v3465_v36 = vld [vmem:[%s4575_s1 + $0x78] sm:$0xff]  }
  0x46   : > { %725 = vmatprep.subr.bf16.mxu0 %v3564_v1  ;;  %1017 = vmatprep.subr.bf16.mxu1 %v3564_v1 }
  0x47   : > { %2919 = vmatprep.mubr.msk.bf16.mxu0 %vm339_vm0, %v3742_v37  ;;  %2937 = vmatprep.mubr.msk.bf16.mxu1 %vm339_vm0, %v3717_v31 }
  0x49   : > { %726 = vmatpush1.bf16.msra.mxu0 %v3394_v38  ;;  %1018 = vmatpush1.bf16.msra.mxu1 %v3395_v39  ;;  %v4040_v38 = vld [vmem:[%s3655_s18 + $0x94] ss:$8 sps:$4 sm:$0xff]  }
  0x4a   : > { %727 = vmatprep.subr.bf16.mxu0 %v3564_v1  ;;  %1019 = vmatprep.subr.bf16.mxu1 %v3564_v1  ;;  %v3467_v39 = vld [vmem:[%s4575_s1 + $0x70] sm:$0xff]  }
  0x4c   : > { %401 = vmatmul.mubr.bf16.gmra.mxu0 %v3756_v40  ;;  %550 = vmatmul.mubr.bf16.gmra.mxu1 %v3730_v34 }
  0x4d   : > { %728 = vmatpush1.bf16.msra.mxu0 %v3396_v41  ;;  %1020 = vmatpush1.bf16.msra.mxu1 %v3397_v42  ;;  %v3471_v41 = vld [vmem:[%s4575_s1 + $0x68] sm:$0xff]   ;;  %v4059_v42 = vld [vmem:[%s3655_s18 + $0x90] ss:$8 sps:$4 sm:$0xff]  }
  0x4e   : > { %729 = vmatprep.subr.bf16.mxu0 %v3564_v1  ;;  %1021 = vmatprep.subr.bf16.mxu1 %v3564_v1 }
  0x4f   : > { %2920 = vmatprep.mubr.msk.bf16.mxu0 %vm339_vm0, %v3769_v43  ;;  %2938 = vmatprep.mubr.msk.bf16.mxu1 %vm339_vm0, %v3742_v37 }
  0x51   : > { %730 = vmatpush1.bf16.msra.mxu0 %v3401_v44  ;;  %1022 = vmatpush1.bf16.msra.mxu1 %v3402_v45  ;;  %v3474_v44 = vld [vmem:[%s4575_s1 + $0x60] sm:$0xff]  }
  0x52   : > { %731 = vmatprep.subr.bf16.mxu0 %v3564_v1  ;;  %1023 = vmatprep.subr.bf16.mxu1 %v3564_v1  ;;  %v3475_v45 = vld [vmem:[%s4575_s1] sm:$0xff]  }
  0x54   : > { %409 = vmatmul.mubr.bf16.gmra.mxu0 %v3784_v46  ;;  %558 = vmatmul.mubr.bf16.gmra.mxu1 %v3756_v40 }
  0x55   : > { %732 = vmatpush1.bf16.msra.mxu0 %v3403_v47  ;;  %1024 = vmatpush1.bf16.msra.mxu1 %v3404_v48  ;;  %v3477_v47 = vld [vmem:[%s4575_s1 + $0x58] sm:$0xff]   ;;  %v3478_v48 = vld [vmem:[%s4575_s1 + $0xb0] sm:$0xff]  }
  0x56   : > { %733 = vmatprep.subr.bf16.mxu0 %v3564_v1  ;;  %1025 = vmatprep.subr.bf16.mxu1 %v3564_v1 }
  0x57   : > { %2983 = vmatprep.mubr.msk.bf16.mxu0 %vm339_vm0, %v3717_v31  ;;  %3034 = vmatprep.mubr.msk.bf16.mxu1 %vm339_vm0, %v3798_v49  ;;  %v3460_v31 = vld [vmem:[%s4575_s1 + $0x30] sm:$0xff]  }
  0x59   : > { %734 = vmatpush1.bf16.msra.mxu0 %v3408_v50  ;;  %1026 = vmatpush1.bf16.msra.mxu1 %v3409_v51  ;;  %v3480_v50 = vld [vmem:[%s4575_s1 + $0xa8] sm:$0xff]  }
  0x5a   : > { %743 = vmatprep.subr.bf16.mxu0 %v3564_v1  ;;  %1035 = vmatprep.subr.bf16.mxu1 %v3564_v1  ;;  %v3481_v51 = vld [vmem:[%s4575_s1 + $0x48] sm:$0xff]  }
  0x5d   : > { %744 = vmatpush2.bf16.msra.mxu0 %v3410_v52  ;;  %1036 = vmatpush2.bf16.msra.mxu1 %v3411_v53  ;;  %v3482_v52 = vld [vmem:[%s4575_s1 + $0xa0] sm:$0xff]  }
  0x5e   : > { %745 = vmatprep.subr.bf16.mxu0 %v3564_v1  ;;  %1037 = vmatprep.subr.bf16.mxu1 %v3564_v1  ;;  %v3483_v53 = vld [vmem:[%s4575_s1 + $0x40] sm:$0xff]  }
  0x61   : > { %746 = vmatpush2.bf16.msra.mxu0 %v3415_v54  ;;  %1038 = vmatpush2.bf16.msra.mxu1 %v3416_v55  ;;  %v3484_v54 = vld [vmem:[%s4575_s1 + $0xf8] sm:$0xff]  }
  0x62   : > { %747 = vmatprep.subr.bf16.mxu0 %v3564_v1  ;;  %1039 = vmatprep.subr.bf16.mxu1 %v3564_v1  ;;  %v3485_v55 = vld [vmem:[%s4575_s1 + $0x98] sm:$0xff]  }
  0x65   : > { %748 = vmatpush2.bf16.msra.mxu0 %v3417_v56  ;;  %1040 = vmatpush2.bf16.msra.mxu1 %v3418_v57  ;;  %v4121_v56 = vld [vmem:[%s3655_s18 + $0xa4] ss:$8 sps:$4 sm:$0xff]   ;;  %v3486_v57 = vld [vmem:[%s4575_s1 + $0xf0] sm:$0xff]  }
  0x66   : > { %749 = vmatprep.subr.bf16.mxu0 %v3564_v1  ;;  %1041 = vmatprep.subr.bf16.mxu1 %v3564_v1 }
  0x69   : > { %750 = vmatpush2.bf16.msra.mxu0 %v3419_v58  ;;  %1042 = vmatpush2.bf16.msra.mxu1 %v3420_v59  ;;  %v3487_v58 = vld [vmem:[%s4575_s1 + $0x90] sm:$0xff]   ;;  %v4136_v59 = vld [vmem:[%s3655_s18 + $0xa0] ss:$8 sps:$4 sm:$0xff]  }
  0x6a   : > { %1160 = vmatprep.subr.bf16.mxu0 %v3564_v1  ;;  %1377 = vmatprep.subr.bf16.mxu1 %v3564_v1 }
  0x6c   : > { %752 = vmatmul.mubr.bf16.vlgmr.msra.gmra.mxu0 %v3730_v34  ;;  %1044 = vmatmul.mubr.bf16.vlgmr.msra.gmra.mxu1 %v3846_v60  ;;  %v3463_v34 = vld [vmem:[%s4575_s1 + $0x80] sm:$0xff]  }
  0x6d   : > { %1161 = vmatpush1.bf16.msra.mxu0 %v3424_v61  ;;  %1378 = vmatpush1.bf16.msra.mxu1 %v3425_v62  ;;  %v3489_v61 = vld [vmem:[%s4575_s1 + $0x88] sm:$0xff]   ;;  %v4149_v62 = vld [vmem:[%s3655_s18 + $0xb4] ss:$8 sps:$4 sm:$0xff]  }
  0x6e   : > { %1162 = vmatprep.subr.bf16.mxu0 %v3564_v1  ;;  %1379 = vmatprep.subr.bf16.mxu1 %v3564_v1 }
  0x6f   : > { %2984 = vmatprep.mubr.msk.bf16.mxu0 %vm339_vm0, %v3742_v37  ;;  %3035 = vmatprep.mubr.msk.bf16.mxu1 %vm339_vm0, %v3858_v63  ;;  %v3466_v37 = vld [vmem:[%s4575_s1 + $0x18] sm:$0xff]  }
  0x71   : > { %1163 = vmatpush1.bf16.msra.mxu0 %v3426_v0  ;;  %1380 = vmatpush1.bf16.msra.mxu1 %v3427_v2  ;;  %v3491_v0 = vld [vmem:[%s4575_s1 + $0x80] sm:$0xff]   ;;  %v4164_v2 = vld [vmem:[%s3655_s18 + $0xb0] ss:$8 sps:$4 sm:$0xff]  }
  0x72   : > { %1164 = vmatprep.subr.bf16.mxu0 %v3564_v1  ;;  %1381 = vmatprep.subr.bf16.mxu1 %v3564_v1 }
  0x74   : > { %760 = vmatmul.mubr.bf16.gmra.mxu0 %v3756_v40  ;;  %1052 = vmatmul.mubr.bf16.gmra.mxu1 %v3882_v5  ;;  %v3468_v40 = vld [vmem:[%s4575_s1 + $0x10] sm:$0xff]  }
  0x75   : > { %1165 = vmatpush1.bf16.msra.mxu0 %v3428_v3  ;;  %2985 = vmatprep.mubr.msk.bf16.mxu0 %vm339_vm0, %v3769_v43  ;;  %v3492_v3 = vld [vmem:[%s4575_s1 + $0xd8] sm:$0xff]  }
  0x76   : > { %1382 = vmatpush1.bf16.msra.mxu1 %v3429_v4  ;;  %1166 = vmatprep.subr.bf16.mxu0 %v3564_v1  ;;  %v3493_v4 = vld [vmem:[%s4575_s1 + $0x78] sm:$0xff]  }
  0x77   : > { %1383 = vmatprep.subr.bf16.mxu1 %v3564_v1  ;;  %3036 = vmatprep.mubr.msk.bf16.mxu1 %vm339_vm0, %v3886_v6 }
  0x79   : > { %1167 = vmatpush1.bf16.msra.mxu0 %v3430_v7  ;;  %v3498_v7 = vld [vmem:[%s4575_s1 + $0x70] sm:$0xff]  }
  0x7a   : > { %1384 = vmatpush1.bf16.msra.mxu1 %v3431_v8  ;;  %1168 = vmatprep.subr.bf16.mxu0 %v3564_v1  ;;  %v4192_v8 = vld [vmem:[%s3655_s18 + $0xc0] ss:$8 sps:$4 sm:$0xff]  }
  0x7b   : > { %1385 = vmatprep.subr.bf16.mxu1 %v3564_v1 }
  0x7c   : > { %768 = vmatmul.mubr.bf16.gmra.mxu0 %v3784_v46  ;;  %1060 = vmatmul.mubr.bf16.gmra.mxu1 %v3910_v11 }
  0x7d   : > { %1169 = vmatpush1.bf16.msra.mxu0 %v3432_v9  ;;  %2986 = vmatprep.mubr.msk.bf16.mxu0 %vm339_vm0, %v3798_v49  ;;  %v3499_v9 = vld [vmem:[%s4575_s1 + $0xc8] sm:$0xff]  }
  0x7e   : > { %1386 = vmatpush1.bf16.msra.mxu1 %v3433_v10  ;;  %1170 = vmatprep.subr.bf16.mxu0 %v3564_v1  ;;  %v3500_v10 = vld [vmem:[%s4575_s1 + $0x68] sm:$0xff]  }
  0x7f   : > { %1387 = vmatprep.subr.bf16.mxu1 %v3564_v1  ;;  %3037 = vmatprep.mubr.msk.bf16.mxu1 %vm339_vm0, %v3914_v12 }
  0x81   : > { %1171 = vmatpush1.bf16.msra.mxu0 %v3437_v13  ;;  %v3505_v13 = vld [vmem:[%s4575_s1 + $0x60] sm:$0xff]  }
  0x82   : > { %1388 = vmatpush1.bf16.msra.mxu1 %v3438_v14  ;;  %1172 = vmatprep.subr.bf16.mxu0 %v3564_v1  ;;  %v3506_v14 = vld [vmem:[%s4575_s1 + $0x118] sm:$0xff]  }
  0x83   : > { %1389 = vmatprep.subr.bf16.mxu1 %v3564_v1 }
  0x84   : > { %776 = vmatmul.mubr.bf16.gmra.mxu0 %v3846_v60  ;;  %1068 = vmatmul.mubr.bf16.gmra.mxu1 %v3938_v17 }
  0x85   : > { %1173 = vmatpush1.bf16.msra.mxu0 %v3439_v15  ;;  %3052 = vmatprep.mubr.msk.bf16.mxu0 %vm339_vm0, %v3769_v43  ;;  %v3472_v43 = vld [vmem:[%s4575_s1 + $0x8] sm:$0xff]   ;;  %v3507_v15 = vld [vmem:[%s4575_s1 + $0xb8] sm:$0xff]  }
  0x86   : > { %1390 = vmatpush1.bf16.msra.mxu1 %v3440_v16  ;;  %1174 = vmatprep.subr.bf16.mxu0 %v3564_v1  ;;  %v3511_v16 = vld [vmem:[%s4575_s1 + $0x110] sm:$0xff]  }
  0x87   : > { %1391 = vmatprep.subr.bf16.mxu1 %v3564_v1  ;;  %3100 = vmatprep.mubr.msk.bf16.mxu1 %vm339_vm0, %v3858_v63 }
  0x89   : > { %1175 = vmatpush1.bf16.msra.mxu0 %v3444_v18  ;;  %v3513_v18 = vld [vmem:[%s4575_s1 + $0x108] sm:$0xff]  }
  0x8a   : > { %1392 = vmatpush1.bf16.msra.mxu1 %v3445_v19  ;;  %1184 = vmatprep.subr.bf16.mxu0 %v3564_v1  ;;  %v3514_v19 = vld [vmem:[%s4575_s1 + $0xa8] sm:$0xff]  }
  0x8b   : > { %1401 = vmatprep.subr.bf16.mxu1 %v3564_v1 }
  0x8d   : > { %1185 = vmatpush2.bf16.msra.mxu0 %v3446_v20  ;;  %v3515_v20 = vld [vmem:[%s4575_s1 + $0x100] sm:$0xff]  }
  0x8e   : > { %1402 = vmatpush2.bf16.msra.mxu1 %v3447_v21  ;;  %1186 = vmatprep.subr.bf16.mxu0 %v3564_v1  ;;  %v3516_v21 = vld [vmem:[%s4575_s1 + $0xa0] sm:$0xff]  }
  0x8f   : > { %1403 = vmatprep.subr.bf16.mxu1 %v3564_v1 }
  0x91   : > { %1187 = vmatpush2.bf16.msra.mxu0 %v3451_v22  ;;  %v4254_v22 = vld [vmem:[%s3655_s18 + $0xd0] ss:$8 sps:$4 sm:$0xff]  }
  0x92   : > { %1404 = vmatpush2.bf16.msra.mxu1 %v3452_v23  ;;  %1188 = vmatprep.subr.bf16.mxu0 %v3564_v1  ;;  %v3520_v23 = vld [vmem:[%s4575_s1 + $0x38] sm:$0xff]  }
  0x93   : > { %1405 = vmatprep.subr.bf16.mxu1 %v3564_v1 }
  0x95   : > { %1189 = vmatpush2.bf16.msra.mxu0 %v3453_v24  ;;  %v3521_v24 = vld [vmem:[%s4575_s1 + $0xf8] sm:$0xff]  }
  0x96   : > { %1406 = vmatpush2.bf16.msra.mxu1 %v3454_v25  ;;  %1190 = vmatprep.subr.bf16.mxu0 %v3564_v1 }
  0x97   : > { %1407 = vmatprep.subr.bf16.mxu1 %v3564_v1 }
  0x99   : > { %1191 = vmatpush2.bf16.msra.mxu0 %v3455_v26  ;;  %v4268_v26 = vld [vmem:[%s3655_s18 + $0xe4] ss:$8 sps:$4 sm:$0xff]  }
  0x9a   : > { %1408 = vmatpush2.bf16.msra.mxu1 %v3456_v27  ;;  %1670 = vmatprep.subr.bf16.mxu0 %v3564_v1 }
  0x9b   : > { %1819 = vmatprep.subr.bf16.mxu1 %v3564_v1 }
  0x9c   : > { %1193 = vmatmul.mubr.bf16.vlgmr.msra.gmra.mxu0 %v3784_v46  ;;  %v3476_v46 = vld [vmem:[%s4575_s1 + $0xb8] sm:$0xff]  }
  0x9d   : > { %1410 = vmatmul.mubr.bf16.vlgmr.msra.gmra.mxu1 %v3882_v5  ;;  %1671 = vmatpush1.bf16.msra.mxu0 %v3457_v28  ;;  %v3522_v28 = vld [vmem:[%s4575_s1 + $0x30] sm:$0xff]  }
  0x9e   : > { %1820 = vmatpush1.bf16.msra.mxu1 %v3458_v29  ;;  %1672 = vmatprep.subr.bf16.mxu0 %v3564_v1 }
  0x9f   : > { %1821 = vmatprep.subr.bf16.mxu1 %v3564_v1  ;;  %3053 = vmatprep.mubr.msk.bf16.mxu0 %vm339_vm0, %v3798_v49  ;;  %v3479_v49 = vld [vmem:[%s4575_s1 + $0x50] sm:$0xff]  }
  0xa0   : > { %3101 = vmatprep.mubr.msk.bf16.mxu1 %vm339_vm0, %v3886_v6 }
  0xa1   : > { %1673 = vmatpush1.bf16.msra.mxu0 %v3459_v30  ;;  %v3523_v30 = vld [vmem:[%s4575_s1 + $0xf0] sm:$0xff]  }
  0xa2   : > { %1822 = vmatpush1.bf16.msra.mxu1 %v3460_v31  ;;  %1674 = vmatprep.subr.bf16.mxu0 %v3564_v1 }
  0xa3   : > { %1823 = vmatprep.subr.bf16.mxu1 %v3564_v1 }
  0xa4   : > { %1201 = vmatmul.mubr.bf16.gmra.mxu0 %v3846_v60  ;;  %v3488_v60 = vld [vmem:[%s4575_s1 + $0xe8] sm:$0xff]  }
  0xa5   : > { %1675 = vmatpush1.bf16.msra.mxu0 %v3461_v32  ;;  %1418 = vmatmul.mubr.bf16.gmra.mxu1 %v3910_v11 }
  0xa6   : > { %1824 = vmatpush1.bf16.msra.mxu1 %v3462_v33  ;;  %1676 = vmatprep.subr.bf16.mxu0 %v3564_v1 }
  0xa7   : > { %1825 = vmatprep.subr.bf16.mxu1 %v3564_v1  ;;  %3054 = vmatprep.mubr.msk.bf16.mxu0 %vm339_vm0, %v3858_v63  ;;  %v3490_v63 = vld [vmem:[%s4575_s1 + $0xe0] sm:$0xff]  }
  0xa8   : > { %3102 = vmatprep.mubr.msk.bf16.mxu1 %vm339_vm0, %v3914_v12 }
  0xa9   : > { %1677 = vmatpush1.bf16.msra.mxu0 %v3463_v34  ;;  %v3524_v34 = vld [vmem:[%s4575_s1 + $0x28] sm:$0xff]  }
  0xaa   : > { %1826 = vmatpush1.bf16.msra.mxu1 %v3464_v35  ;;  %1678 = vmatprep.subr.bf16.mxu0 %v3564_v1 }
  0xab   : > { %1827 = vmatprep.subr.bf16.mxu1 %v3564_v1 }
  0xac   : > { %1209 = vmatmul.mubr.bf16.gmra.mxu0 %v3882_v5  ;;  %v4177_v5 = vld [vmem:[%s3655_s18 + $0xc4] ss:$8 sps:$4 sm:$0xff]  }
  0xad   : > { %1679 = vmatpush1.bf16.msra.mxu0 %v3465_v36  ;;  %1426 = vmatmul.mubr.bf16.gmra.mxu1 %v3938_v17  ;;  %v3525_v36 = vld [vmem:[%s4575_s1 + $0xe8] sm:$0xff]  }
  0xae   : > { %1828 = vmatpush1.bf16.msra.mxu1 %v3466_v37  ;;  %1680 = vmatprep.subr.bf16.mxu0 %v3564_v1 }
  0xaf   : > { %1829 = vmatprep.subr.bf16.mxu1 %v3564_v1  ;;  %3055 = vmatprep.mubr.msk.bf16.mxu0 %vm339_vm0, %v3886_v6  ;;  %v3497_v6 = vld [vmem:[%s4575_s1 + $0xd0] sm:$0xff]  }
  0xb0   : > { %3103 = vmatprep.mubr.msk.bf16.mxu1 %vm339_vm0, %v4040_v38 }
  0xb1   : > { %1681 = vmatpush1.bf16.msra.mxu0 %v3467_v39 }
  0xb2   : > { %1830 = vmatpush1.bf16.msra.mxu1 %v3468_v40  ;;  %1682 = vmatprep.subr.bf16.mxu0 %v3564_v1  ;;  %v4304_v40 = vld [vmem:[%s3655_s18 + $0xf4] ss:$8 sps:$4 sm:$0xff]  }
  0xb3   : > { %1831 = vmatprep.subr.bf16.mxu1 %v3564_v1 }
  0xb4   : > { %1217 = vmatmul.mubr.bf16.gmra.mxu0 %v3910_v11  ;;  %v4206_v11 = vld [vmem:[%s3655_s18 + $0xd4] ss:$8 sps:$4 sm:$0xff]  }
  0xb5   : > { %1683 = vmatpush1.bf16.msra.mxu0 %v3471_v41  ;;  %1434 = vmatmul.mubr.bf16.gmra.mxu1 %v4059_v42  ;;  %v3526_v41 = vld [vmem:[%s4575_s1 + $0x20] sm:$0xff]  }
  0xb6   : > { %1832 = vmatpush1.bf16.msra.mxu1 %v3472_v43  ;;  %1684 = vmatprep.subr.bf16.mxu0 %v3564_v1  ;;  %v3527_v43 = vld [vmem:[%s4575_s1 + $0xe0] sm:$0xff]  }
  0xb7   : > { %1833 = vmatprep.subr.bf16.mxu1 %v3564_v1  ;;  %3152 = vmatprep.mubr.msk.bf16.mxu0 %vm339_vm0, %v4040_v38 }
  0xb8   : > { %3170 = vmatprep.mubr.msk.bf16.mxu1 %vm339_vm0, %v3914_v12  ;;  %v3504_v12 = vld [vmem:[%s4575_s1 + $0xc0] sm:$0xff]  }
  0xb9   : > { %1685 = vmatpush1.bf16.msra.mxu0 %v3474_v44 }
  0xba   : > { %1834 = vmatpush1.bf16.msra.mxu1 %v3475_v45  ;;  %1694 = vmatprep.subr.bf16.mxu0 %v3564_v1 }
  0xbb   : > { %1843 = vmatprep.subr.bf16.mxu1 %v3564_v1 }
  0xbd   : > { %1695 = vmatpush2.bf16.msra.mxu0 %v3476_v46 }
  0xbe   : > { %1844 = vmatpush2.bf16.msra.mxu1 %v3477_v47  ;;  %1696 = vmatprep.subr.bf16.mxu0 %v3564_v1  ;;  %v3528_v47 = vld [vmem:[%s4575_s1 + $0x18] sm:$0xff]  }
  0xbf   : > { %1845 = vmatprep.subr.bf16.mxu1 %v3564_v1 }
  0xc1   : > { %1697 = vmatpush2.bf16.msra.mxu0 %v3478_v48 }
  0xc2   : > { %1846 = vmatpush2.bf16.msra.mxu1 %v3479_v49  ;;  %1698 = vmatprep.subr.bf16.mxu0 %v3564_v1  ;;  %v3529_v49 = vld [vmem:[%s4575_s1 + $0xd8] sm:$0xff]  }
  0xc3   : > { %1847 = vmatprep.subr.bf16.mxu1 %v3564_v1 }
  0xc5   : > { %1699 = vmatpush2.bf16.msra.mxu0 %v3480_v50 }
  0xc6   : > { %1848 = vmatpush2.bf16.msra.mxu1 %v3481_v51  ;;  %1700 = vmatprep.subr.bf16.mxu0 %v3564_v1 }
  0xc7   : > { %1849 = vmatprep.subr.bf16.mxu1 %v3564_v1 }
  0xc9   : > { %1701 = vmatpush2.bf16.msra.mxu0 %v3482_v52  ;;  %v4334_v52 = vld [vmem:[%s3655_s18 + $0xf0] ss:$8 sps:$4 sm:$0xff]  }
  0xca   : > { %1850 = vmatpush2.bf16.msra.mxu1 %v3483_v53  ;;  %2036 = vmatprep.subr.bf16.mxu0 %v3564_v1 }
  0xcb   : > { %2329 = vmatprep.subr.bf16.mxu1 %v3564_v1 }
  0xcc   : > { %1703 = vmatmul.mubr.bf16.vlgmr.msra.gmra.mxu0 %v4059_v42 }
  0xcd   : > { %1852 = vmatmul.mubr.bf16.vlgmr.msra.gmra.mxu1 %v3938_v17  ;;  %2037 = vmatpush1.bf16.msra.mxu0 %v3484_v54  ;;  %v3512_v17 = vld [vmem:[%s4575_s1 + $0xb0] sm:$0xff]   ;;  %v4340_v54 = vld [vmem:[%s3655_s18 + $0x104] ss:$8 sps:$4 sm:$0xff]  }
  0xce   : > { %2330 = vmatpush1.bf16.msra.mxu1 %v3485_v55  ;;  %2038 = vmatprep.subr.bf16.mxu0 %v3564_v1  ;;  %v3533_v55 = vld [vmem:[%s4575_s1 + $0x10] sm:$0xff]  }
  0xcf   : > { %2331 = vmatprep.subr.bf16.mxu1 %v3564_v1  ;;  %3153 = vmatprep.mubr.msk.bf16.mxu0 %vm339_vm0, %v4121_v56 }
  0xd0   : > { %3171 = vmatprep.mubr.msk.bf16.mxu1 %vm339_vm0, %v4040_v38  ;;  %v4298_v38 = vld [vmem:[%s3655_s18 + $0xe0] ss:$8 sps:$4 sm:$0xff]  }
  0xd1   : > { %2039 = vmatpush1.bf16.msra.mxu0 %v3486_v57  ;;  %v3534_v57 = vld [vmem:[%s4575_s1 + $0xd0] sm:$0xff]  }
  0xd2   : > { %2332 = vmatpush1.bf16.msra.mxu1 %v3487_v58  ;;  %2040 = vmatprep.subr.bf16.mxu0 %v3564_v1 }
  0xd3   : > { %2333 = vmatprep.subr.bf16.mxu1 %v3564_v1 }
  0xd4   : > { %1711 = vmatmul.mubr.bf16.gmra.mxu0 %v4136_v59 }
  0xd5   : > { %2041 = vmatpush1.bf16.msra.mxu0 %v3488_v60  ;;  %1860 = vmatmul.mubr.bf16.gmra.mxu1 %v4059_v42 }
  0xd6   : > { %2334 = vmatpush1.bf16.msra.mxu1 %v3489_v61  ;;  %2042 = vmatprep.subr.bf16.mxu0 %v3564_v1  ;;  %v3535_v61 = vld [vmem:[%s4575_s1 + $0x8] sm:$0xff]  }
  0xd7   : > { %2335 = vmatprep.subr.bf16.mxu1 %v3564_v1  ;;  %3154 = vmatprep.mubr.msk.bf16.mxu0 %vm339_vm0, %v4149_v62 }
  0xd8   : > { %3172 = vmatprep.mubr.msk.bf16.mxu1 %vm339_vm0, %v4121_v56 }
  0xd9   : > { %2043 = vmatpush1.bf16.msra.mxu0 %v3490_v63  ;;  %v3536_v63 = vld [vmem:[%s4575_s1 + $0xc8] sm:$0xff]  }
  0xda   : > { %2336 = vmatpush1.bf16.msra.mxu1 %v3491_v0  ;;  %2044 = vmatprep.subr.bf16.mxu0 %v3564_v1 }
  0xdb   : > { %2337 = vmatprep.subr.bf16.mxu1 %v3564_v1 }
  0xdc   : > { %1719 = vmatmul.mubr.bf16.gmra.mxu0 %v4164_v2 }
  0xdd   : > { %2045 = vmatpush1.bf16.msra.mxu0 %v3492_v3  ;;  %1868 = vmatmul.mubr.bf16.gmra.mxu1 %v4136_v59  ;;  %v4370_v3 = vld [vmem:[%s3655_s18 + $0x100] ss:$8 sps:$4 sm:$0xff]  }
  0xde   : > { %2338 = vmatpush1.bf16.msra.mxu1 %v3493_v4  ;;  %2046 = vmatprep.subr.bf16.mxu0 %v3564_v1 }
  0xdf   : > { %2339 = vmatprep.subr.bf16.mxu1 %v3564_v1  ;;  %3155 = vmatprep.mubr.msk.bf16.mxu0 %vm339_vm0, %v4177_v5 }
  0xe0   : > { %3173 = vmatprep.mubr.msk.bf16.mxu1 %vm339_vm0, %v4149_v62 }
  0xe1   : > { %2047 = vmatpush1.bf16.msra.mxu0 %v3497_v6  ;;  %v3540_v6 = vld [vmem:[%s4575_s1] sm:$0xff]  }
  0xe2   : > { %2340 = vmatpush1.bf16.msra.mxu1 %v3498_v7  ;;  %2048 = vmatprep.subr.bf16.mxu0 %v3564_v1 }
  0xe3   : > { %2341 = vmatprep.subr.bf16.mxu1 %v3564_v1 }
  0xe4   : > { %1727 = vmatmul.mubr.bf16.gmra.mxu0 %v4192_v8 }
  0xe5   : > { %2049 = vmatpush1.bf16.msra.mxu0 %v3499_v9  ;;  %1876 = vmatmul.mubr.bf16.gmra.mxu1 %v4164_v2  ;;  %v3541_v9 = vld [vmem:[%s4575_s1 + $0xc0] sm:$0xff]  }
  0xe6   : > { %2342 = vmatpush1.bf16.msra.mxu1 %v3500_v10  ;;  %2050 = vmatprep.subr.bf16.mxu0 %v3564_v1 }
  0xe7   : > { %2343 = vmatprep.subr.bf16.mxu1 %v3564_v1  ;;  %3218 = vmatprep.mubr.msk.bf16.mxu0 %vm339_vm0, %v4121_v56 }
  0xe8   : > { %3270 = vmatprep.mubr.msk.bf16.mxu1 %vm339_vm0, %v4206_v11 }
  0xe9   : > { %2051 = vmatpush1.bf16.msra.mxu0 %v3504_v12 }
  0xea   : > { %2344 = vmatpush1.bf16.msra.mxu1 %v3505_v13  ;;  %2060 = vmatprep.subr.bf16.mxu0 %v3564_v1 }
  0xeb   : > { %2353 = vmatprep.subr.bf16.mxu1 %v3564_v1 }
  0xed   : > { %2061 = vmatpush2.bf16.msra.mxu0 %v3506_v14 }
  0xee   : > { %2354 = vmatpush2.bf16.msra.mxu1 %v3507_v15  ;;  %2062 = vmatprep.subr.bf16.mxu0 %v3564_v1  ;;  %v3543_v15 = vld [vmem:[%s4575_s1 + $0x118] sm:$0xff]  }
  0xef   : > { %2355 = vmatprep.subr.bf16.mxu1 %v3564_v1 }
  0xf1   : > { %2063 = vmatpush2.bf16.msra.mxu0 %v3511_v16 }
  0xf2   : > { %2356 = vmatpush2.bf16.msra.mxu1 %v3512_v17  ;;  %2064 = vmatprep.subr.bf16.mxu0 %v3564_v1 }
  0xf3   : > { %2357 = vmatprep.subr.bf16.mxu1 %v3564_v1 }
  0xf5   : > { %2065 = vmatpush2.bf16.msra.mxu0 %v3513_v18  ;;  %v3547_v18 = vld [vmem:[%s4575_s1 + $0x50] sm:$0xff]  }
  0xf6   : > { %2358 = vmatpush2.bf16.msra.mxu1 %v3514_v19  ;;  %2066 = vmatprep.subr.bf16.mxu0 %v3564_v1  ;;  %v3548_v19 = vld [vmem:[%s4575_s1 + $0x110] sm:$0xff]  }
  0xf7   : > { %2359 = vmatprep.subr.bf16.mxu1 %v3564_v1 }
  0xf9   : > { %2067 = vmatpush2.bf16.msra.mxu0 %v3515_v20  ;;  %v3549_v20 = vld [vmem:[%s4575_s1 + $0x48] sm:$0xff]  }
  0xfa   : > { %2360 = vmatpush2.bf16.msra.mxu1 %v3516_v21  ;;  %2478 = vmatprep.subr.bf16.mxu0 %v3564_v1  ;;  %v3550_v21 = vld [vmem:[%s4575_s1 + $0x108] sm:$0xff]  }
  0xfb   : > { %2695 = vmatprep.subr.bf16.mxu1 %v3564_v1 }
  0xfc   : > { %v4264_v25 = vpop.f32.mrf.mxu0  ;;  %2069 = vmatmul.mubr.bf16.vlgmr.msra.gmra.mxu0 %v4136_v59  ;;  %v4270_v27 = vpop.f32.mrf.mxu1 }
  0xfd   : > { %2362 = vmatmul.mubr.bf16.vlgmr.msra.gmra.mxu1 %v4254_v22  ;;  %2479 = vmatpush1.bf16.msra.mxu0 %v3520_v23  ;;  %v3551_v23 = vld [vmem:[%s4575_s1 + $0x40] sm:$0xff]  }
  0xfe   : > { %2696 = vmatpush1.bf16.msra.mxu1 %v3521_v24  ;;  %v388_v29 = vpop.f32.mrf.mxu0  ;;  %2480 = vmatprep.subr.bf16.mxu0 %v3564_v1  ;;  %v537_v31 = vpop.f32.mrf.mxu1  ;;  %v3552_v24 = vld [vmem:[%s4575_s1 + $0x100] sm:$0xff]  }
  0xff   : > { %2697 = vmatprep.subr.bf16.mxu1 %v3564_v1  ;;  %3219 = vmatprep.mubr.msk.bf16.mxu0 %vm339_vm0, %v4149_v62 }
 0x100   : > { %v4283_v32 = vpop.f32.mrf.mxu0  ;;  %3271 = vmatprep.mubr.msk.bf16.mxu1 %vm339_vm0, %v4268_v26  ;;  %v4287_v33 = vpop.f32.mrf.mxu1 }
 0x101   : > { %2481 = vmatpush1.bf16.msra.mxu0 %v3522_v28 }
 0x102   : > { %2698 = vmatpush1.bf16.msra.mxu1 %v3523_v30  ;;  %v391_v35 = vpop.f32.mrf.mxu0  ;;  %2482 = vmatprep.subr.bf16.mxu0 %v3564_v1  ;;  %v540_v37 = vpop.f32.mrf.mxu1 }
 0x103   : > { %2699 = vmatprep.subr.bf16.mxu1 %v3564_v1 }
 0x104   : > { %2077 = vmatmul.mubr.bf16.gmra.mxu0 %v4164_v2  ;;  %v4301_v39 = vpop.f32.mrf.mxu0  ;;  %v4311_v42 = vpop.f32.mrf.mxu1 }
 0x105   : > { %2483 = vmatpush1.bf16.msra.mxu0 %v3524_v34  ;;  %3220 = vmatprep.mubr.msk.bf16.mxu0 %vm339_vm0, %v4177_v5 }
 0x106   : > { %2700 = vmatpush1.bf16.msra.mxu1 %v3525_v36  ;;  %2484 = vmatprep.subr.bf16.mxu0 %v3564_v1  ;;  %v396_v44 = vpop.f32.mrf.mxu0  ;;  %v545_v45 = vpop.f32.mrf.mxu1 }
 0x107   : > { %2701 = vmatprep.subr.bf16.mxu1 %v3564_v1  ;;  %2370 = vmatmul.mubr.bf16.gmra.mxu1 %v4298_v38 }
 0x108   : > { %v4319_v46 = vpop.f32.mrf.mxu0  ;;  %3272 = vmatprep.mubr.msk.bf16.mxu1 %vm339_vm0, %v4304_v40  ;;  %v4326_v48 = vpop.f32.mrf.mxu1 }
 0x109   : > { %2485 = vmatpush1.bf16.msra.mxu0 %v3526_v41  ;;  %v536_v41 = vadd.f32 %v4270_v27, %v4264_v25 }
 0x10a   : > { %2702 = vmatpush1.bf16.msra.mxu1 %v3527_v43  ;;  %2486 = vmatprep.subr.bf16.mxu0 %v3564_v1  ;;  %v399_v50 = vpop.f32.mrf.mxu0  ;;  %v548_v51 = vpop.f32.mrf.mxu1  ;;  %v539_v43 = vadd.f32 %v4287_v33, %v4283_v32 }
 0x10b   : > { %2703 = vmatprep.subr.bf16.mxu1 %v3564_v1  ;;  %v3553_v51 = vld [vmem:[%s3655_s18 + $0x114] ss:$8 sps:$4 sm:$0xff]  }
 0x10c   : > { %2085 = vmatmul.mubr.bf16.gmra.mxu0 %v4192_v8  ;;  %v4337_v53 = vpop.f32.mrf.mxu0  ;;  %v4347_v56 = vpop.f32.mrf.mxu1 }
 0x10d   : > { %2487 = vmatpush1.bf16.msra.mxu0 %v3528_v47  ;;  %3221 = vmatprep.mubr.msk.bf16.mxu0 %vm339_vm0, %v4206_v11 }
 0x10e   : > { %2704 = vmatpush1.bf16.msra.mxu1 %v3529_v49  ;;  %2488 = vmatprep.subr.bf16.mxu0 %v3564_v1  ;;  %v404_v58 = vpop.f32.mrf.mxu0  ;;  %v553_v59 = vpop.f32.mrf.mxu1 }
 0x10f   : > { %2705 = vmatprep.subr.bf16.mxu1 %v3564_v1  ;;  %2378 = vmatmul.mubr.bf16.gmra.mxu1 %v4334_v52  ;;  %v3555_v58 = vld [vmem:[%s3655_s18 + $0x110] ss:$8 sps:$4 sm:$0xff]  }
 0x110   : > { %v4355_v60 = vpop.f32.mrf.mxu0  ;;  %3273 = vmatprep.mubr.msk.bf16.mxu1 %vm339_vm0, %v4340_v54  ;;  %v4362_v62 = vpop.f32.mrf.mxu1 }
 0x111   : > { %2489 = vmatpush1.bf16.msra.mxu0 %v3533_v55 }
 0x112   : > { %2706 = vmatpush1.bf16.msra.mxu1 %v3534_v57  ;;  %2490 = vmatprep.subr.bf16.mxu0 %v3564_v1  ;;  %v407_v0 = vpop.f32.mrf.mxu0  ;;  %v556_v2 = vpop.f32.mrf.mxu1 }
 0x113   : > { %2707 = vmatprep.subr.bf16.mxu1 %v3564_v1 }
 0x114   : > { %2093 = vmatmul.mubr.bf16.gmra.mxu0 %v4254_v22  ;;  %v4373_v4 = vpop.f32.mrf.mxu0  ;;  %v4378_v7 = vpop.f32.mrf.mxu1 }
 0x115   : > { %2491 = vmatpush1.bf16.msra.mxu0 %v3535_v61  ;;  %3288 = vmatprep.mubr.msk.bf16.mxu0 %vm339_vm0, %v4177_v5  ;;  %v3542_v5 = vld [vmem:[%s4575_s1 + $0x58] sm:$0xff]  }
 0x116   : > { %2708 = vmatpush1.bf16.msra.mxu1 %v3536_v63  ;;  %2492 = vmatprep.subr.bf16.mxu0 %v3564_v1  ;;  %v412_v10 = vpop.f32.mrf.mxu0  ;;  %v561_v12 = vpop.f32.mrf.mxu1 }
 0x117   : > { %2709 = vmatprep.subr.bf16.mxu1 %v3564_v1  ;;  %2386 = vmatmul.mubr.bf16.gmra.mxu1 %v4370_v3 }
 0x118   : > { %v4388_v13 = vpop.f32.mrf.mxu0  ;;  %3336 = vmatprep.mubr.msk.bf16.mxu1 %vm339_vm0, %v4268_v26  ;;  %v4395_v14 = vpop.f32.mrf.mxu1 }
 0x119   : > { %2493 = vmatpush1.bf16.msra.mxu0 %v3540_v6  ;;  %v555_v6 = vadd.f32 %v4362_v62, %v4355_v60 }
 0x11a   : > { %2710 = vmatpush1.bf16.msra.mxu1 %v3541_v9  ;;  %2502 = vmatprep.subr.bf16.mxu0 %v3564_v1  ;;  %v415_v16 = vpop.f32.mrf.mxu0  ;;  %v564_v17 = vpop.f32.mrf.mxu1  ;;  %v563_v9 = vadd.f32 %v4395_v14, %v4388_v13 }
 0x11b   : > { %2719 = vmatprep.subr.bf16.mxu1 %v3564_v1 }
 0x11d   : > { %2503 = vmatpush2.bf16.msra.mxu0 %v3542_v5 }
 0x11e   : > { %2720 = vmatpush2.bf16.msra.mxu1 %v3543_v15  ;;  %2504 = vmatprep.subr.bf16.mxu0 %v3564_v1 }
 0x11f   : > { %2721 = vmatprep.subr.bf16.mxu1 %v3564_v1 }
 0x121   : > { %2505 = vmatpush2.bf16.msra.mxu0 %v3547_v18 }
 0x122   : > { %2722 = vmatpush2.bf16.msra.mxu1 %v3548_v19  ;;  %2506 = vmatprep.subr.bf16.mxu0 %v3564_v1 }
 0x123   : > { %2723 = vmatprep.subr.bf16.mxu1 %v3564_v1 }
 0x125   : > { %2507 = vmatpush2.bf16.msra.mxu0 %v3549_v20 }
 0x126   : > { %2724 = vmatpush2.bf16.msra.mxu1 %v3550_v21  ;;  %2508 = vmatprep.subr.bf16.mxu0 %v3564_v1 }
 0x127   : > { %2725 = vmatprep.subr.bf16.mxu1 %v3564_v1 }
 0x129   : > { %2509 = vmatpush2.bf16.msra.mxu0 %v3551_v23 }
 0x12a   : > { %2726 = vmatpush2.bf16.msra.mxu1 %v3552_v24 }
 0x12c   : > { %v753_v28 = vpop.f32.mrf.mxu0  ;;  %2511 = vmatmul.mubr.bf16.vlgmr.msra.gmra.mxu0 %v4192_v8  ;;  %v4427_v29 = vpop.f32.mrf.mxu1  ;;  %v544_v8 = vadd.f32 %v4311_v42, %v4301_v39 }
 0x12d   : > { %2728 = vmatmul.mubr.bf16.vlgmr.msra.gmra.mxu1 %v4298_v38  ;;  %3289 = vmatprep.mubr.msk.bf16.mxu0 %vm339_vm0, %v4206_v11  ;;  %v784_v45 = vadd.f32 %v753_v28, %v536_v41 }
 0x12e   : > { %v755_v30 = vpop.f32.mrf.mxu0  ;;  %3337 = vmatprep.mubr.msk.bf16.mxu1 %vm339_vm0, %v4304_v40  ;;  %v1047_v31 = vpop.f32.mrf.mxu1 }
 0x130   : > { %v756_v34 = vpop.f32.mrf.mxu0  ;;  %v4434_v35 = vpop.f32.mrf.mxu1 }
 0x131   : > { %v785_v47 = vadd.f32 %v756_v34, %v539_v43 }
 0x132   : > { %v758_v1 = vpop.f32.mrf.mxu0  ;;  %v1050_v36 = vpop.f32.mrf.mxu1 }
 0x134   : > { %v761_v37 = vpop.f32.mrf.mxu0  ;;  %2519 = vmatmul.mubr.bf16.gmra.mxu0 %v4254_v22  ;;  %v547_v22 = vadd.f32 %v4326_v48, %v4319_v46  ;;  %v1053_v42 = vpop.f32.mrf.mxu1 }
 0x135   : > { %2736 = vmatmul.mubr.bf16.gmra.mxu1 %v4334_v52  ;;  %3290 = vmatprep.mubr.msk.bf16.mxu0 %vm339_vm0, %v4268_v26  ;;  %v786_v39 = vadd.f32 %v761_v37, %v544_v8 }
 0x136   : > { %v763_v11 = vpop.f32.mrf.mxu0  ;;  %3338 = vmatprep.mubr.msk.bf16.mxu1 %vm339_vm0, %v4340_v54  ;;  %v1055_v26 = vpop.f32.mrf.mxu1 }
 0x137   : > { %v792_v54 = vmax.f32 %v784_v45, %v786_v39 }
 0x138   : > { %v764_v44 = vpop.f32.mrf.mxu0  ;;  %v1056_v57 = vpop.f32.mrf.mxu1 }
 0x139   : > { %v787_v49 = vadd.f32 %v764_v44, %v547_v22 }
 0x13a   : > { %v766_v50 = vpop.f32.mrf.mxu0  ;;  %v1058_v32 = vpop.f32.mrf.mxu1 }
 0x13b   : > { %v793_v55 = vmax.f32 %v785_v47, %v787_v49 }
 0x13c   : > { %v769_v25 = vpop.f32.mrf.mxu0  ;;  %2527 = vmatmul.mubr.bf16.gmra.mxu0 %v4298_v38  ;;  %v4460_v46 = vpop.f32.mrf.mxu1 }
 0x13d   : > { %2744 = vmatmul.mubr.bf16.gmra.mxu1 %v4370_v3  ;;  %v4453_v27 = vmax.f32 %v792_v54, %v793_v55  ;;  %3291 = vmatprep.mubr.msk.bf16.mxu0 %vm339_vm0, %v4304_v40  ;;  %v560_v40 = vadd.f32 %v4378_v7, %v4373_v4  ;;  %v552_v3 = vadd.f32 %v4347_v56, %v4337_v53 }
 0x13e   : > { %v771_v33 = vpop.f32.mrf.mxu0  ;;  %3339 = vmatprep.mubr.msk.bf16.mxu1 %vm339_vm0, %v3553_v51  ;;  %v1063_v38 = vpop.f32.mrf.mxu1 }
 0x13f   : > { %796 = vrot.lane.b32.xlu0 %v4453_v27, %s3565_s16  ;;  %v788_v15 = vadd.f32 %v769_v25, %v552_v3 }
 0x140   : > { %v772_v48 = vpop.f32.mrf.mxu0  ;;  %v4463_v61 = vpop.f32.mrf.mxu1 }
 0x142   : > { %v774_v59 = vpop.f32.mrf.mxu0  ;;  %v1066_v0 = vpop.f32.mrf.mxu1 }
 0x144   : > { %v777_v63 = vpop.f32.mrf.mxu0  ;;  %2535 = vmatmul.mubr.bf16.gmra.mxu0 %v4334_v52  ;;  %v1069_v12 = vpop.f32.mrf.mxu1  ;;  %v789_v52 = vadd.f32 %v772_v48, %v555_v6 }
 0x145   : > { %2752 = vmatmul.mubr.bf16.gmra.mxu1 %v3555_v58  ;;  %v790_v10 = vadd.f32 %v777_v63, %v560_v40 }
 0x146   : > { %v779_v2 = vpop.f32.mrf.mxu0  ;;  %v1071_v17 = vpop.f32.mrf.mxu1 }
 0x147   : > { %v812_v7 = vmax.f32 %v788_v15, %v790_v10 }
 0x148   : > { %v780_v5 = vpop.f32.mrf.mxu0  ;;  %v1072_v19 = vpop.f32.mrf.mxu1 }
 0x149   : > { %v791_v16 = vadd.f32 %v780_v5, %v563_v9 }
 0x14a   : > { %v782_v4 = vpop.f32.mrf.mxu0  ;;  %v1074_v53 = vpop.f32.mrf.mxu1 }
 0x14b   : > { %v813_v18 = vmax.f32 %v789_v52, %v791_v16 }
 0x14d   : > { %v4474_v20 = vmax.f32 %v812_v7, %v813_v18 }
 0x14f   : > { %816 = vrot.lane.b32.xlu0 %v4474_v20, %s3565_s16 }
 0x15c   : > { %v1194_v56 = vpop.f32.mrf.mxu0 }
 0x15d   : > { %v1411_v60 = vpop.f32.mrf.mxu1  ;;  %v1195_v1 = vadd.f32 %v1194_v56, %v4427_v29 }
 0x15e   : > { %v1196_v62 = vpop.f32.mrf.mxu0 }
 0x15f   : > { %v1413_v13 = vpop.f32.mrf.mxu1  ;;  %v1442_v39 = vadd.f32 %v1411_v60, %v1195_v1 }
 0x160   : > { %v1197_v14 = vpop.f32.mrf.mxu0 }
 0x161   : > { %v1414_v21 = vpop.f32.mrf.mxu1  ;;  %v1198_v36 = vadd.f32 %v1197_v14, %v4434_v35 }
 0x162   : > { %v1199_v23 = vpop.f32.mrf.mxu0 }
 0x163   : > { %v1416_v24 = vpop.f32.mrf.mxu1  ;;  %v1443_v44 = vadd.f32 %v1414_v21, %v1198_v36 }
 0x164   : > { %v1202_v28 = vpop.f32.mrf.mxu0 }
 0x165   : > { %v1203_v30 = vadd.f32 %v1202_v28, %v1053_v42  ;;  %v1419_v31 = vpop.f32.mrf.mxu1 }
 0x166   : > { %v1204_v34 = vpop.f32.mrf.mxu0 }
 0x167   : > { %v1421_v37 = vpop.f32.mrf.mxu1  ;;  %v1444_v11 = vadd.f32 %v1419_v31, %v1203_v30 }
 0x168   : > { %v1205_v8 = vpop.f32.mrf.mxu0 }
 0x169   : > { %v1206_v41 = vadd.f32 %v1205_v8, %v1056_v57  ;;  %v1422_v43 = vpop.f32.mrf.mxu1  ;;  %v1450_v26 = vmax.f32 %v1442_v39, %v1444_v11 }
 0x16a   : > { %v1207_v22 = vpop.f32.mrf.mxu0 }
 0x16b   : > { %v1445_v45 = vadd.f32 %v1422_v43, %v1206_v41  ;;  %v1424_v47 = vpop.f32.mrf.mxu1 }
 0x16c   : > { %v1210_v49 = vpop.f32.mrf.mxu0 }
 0x16d   : > { %v1451_v50 = vmax.f32 %v1443_v44, %v1445_v45  ;;  %v1427_v42 = vpop.f32.mrf.mxu1  ;;  %v1211_v38 = vadd.f32 %v1210_v49, %v4460_v46  ;;  %v4501_v49 = vld [vmem:[%s4576_s2] ss:$0 sm:$0xff] }
 0x16e   : > { %v1212_v51 = vpop.f32.mrf.mxu0 }
 0x16f   : > { %v1429_v54 = vpop.f32.mrf.mxu1  ;;  %v4480_v55 = vmax.f32 %v1450_v26, %v1451_v50  ;;  %v1446_v9 = vadd.f32 %v1427_v42, %v1211_v38 }
 0x170   : > { %v1213_v29 = vpop.f32.mrf.mxu0 }
 0x171   : > { %1454 = vrot.lane.b32.xlu1 %v4480_v55, %s3565_s16  ;;  %v1430_v35 = vpop.f32.mrf.mxu1  ;;  %v1214_v59 = vadd.f32 %v1213_v29, %v4463_v61 }
 0x172   : > { %v1215_v57 = vpop.f32.mrf.mxu0 }
 0x173   : > { %v1432_v25 = vpop.f32.mrf.mxu1  ;;  %v1447_v10 = vadd.f32 %v1430_v35, %v1214_v59 }
 0x174   : > { %v1218_v32 = vpop.f32.mrf.mxu0 }
 0x175   : > { %v1219_v33 = vadd.f32 %v1218_v32, %v1069_v12  ;;  %v1435_v48 = vpop.f32.mrf.mxu1 }
 0x176   : > { %v1220_v58 = vpop.f32.mrf.mxu0 }
 0x177   : > { %v1437_v63 = vpop.f32.mrf.mxu1  ;;  %v1448_v0 = vadd.f32 %v1435_v48, %v1219_v33 }
 0x178   : > { %v1221_v40 = vpop.f32.mrf.mxu0 }
 0x179   : > { %v1222_v2 = vadd.f32 %v1221_v40, %v1072_v19  ;;  %v1438_v3 = vpop.f32.mrf.mxu1  ;;  %v1471_v52 = vmax.f32 %v1446_v9, %v1448_v0 }
 0x17a   : > { %v1223_v6 = vpop.f32.mrf.mxu0 }
 0x17b   : > { %v1449_v5 = vadd.f32 %v1438_v3, %v1222_v2  ;;  %v1440_v15 = vpop.f32.mrf.mxu1 }
 0x17d   : > { %v1472_v16 = vmax.f32 %v1447_v10, %v1449_v5 }
 0x17f   : > { %v4486_v17 = vmax.f32 %v1471_v52, %v1472_v16 }
 0x181   : > { %1475 = vrot.lane.b32.xlu1 %v4486_v17, %s3565_s16 }
 0x18c   : > { %v1704_v46 = vpop.f32.mrf.mxu0 }
 0x18d   : > { %v1853_v12 = vpop.f32.mrf.mxu1 }
 0x18e   : > { %v1706_v61 = vpop.f32.mrf.mxu0  ;;  %v1854_v3 = vadd.f32 %v1853_v12, %v1704_v46 }
 0x18f   : > { %v1855_v4 = vpop.f32.mrf.mxu1 }
 0x190   : > { %v1707_v7 = vpop.f32.mrf.mxu0 }
 0x191   : > { %v1856_v18 = vpop.f32.mrf.mxu1 }
 0x192   : > { %v1709_v19 = vpop.f32.mrf.mxu0  ;;  %v1857_v6 = vadd.f32 %v1856_v18, %v1707_v7 }
 0x193   : > { %v1858_v53 = vpop.f32.mrf.mxu1 }
 0x194   : > { %v1712_v56 = vpop.f32.mrf.mxu0 }
 0x195   : > { %v1861_v60 = vpop.f32.mrf.mxu1 }
 0x196   : > { %v1714_v62 = vpop.f32.mrf.mxu0  ;;  %v1862_v40 = vadd.f32 %v1861_v60, %v1712_v56 }
 0x197   : > { %v1863_v13 = vpop.f32.mrf.mxu1 }
 0x198   : > { %v1715_v14 = vpop.f32.mrf.mxu0 }
 0x199   : > { %v1864_v21 = vpop.f32.mrf.mxu1 }
 0x19a   : > { %v1717_v23 = vpop.f32.mrf.mxu0  ;;  %v1865_v9 = vadd.f32 %v1864_v21, %v1715_v14 }
 0x19b   : > { %v1866_v24 = vpop.f32.mrf.mxu1 }
 0x19c   : > { %v4490_v28 = vpop.f32.mrf.mxu0 }
 0x19d   : > { %v4492_v30 = vpop.f32.mrf.mxu1 }
 0x19e   : > { %v1722_v31 = vpop.f32.mrf.mxu0 }
 0x19f   : > { %v1871_v34 = vpop.f32.mrf.mxu1 }
 0x1a0   : > { %v4494_v1 = vpop.f32.mrf.mxu0 }
 0x1a1   : > { %v4496_v36 = vpop.f32.mrf.mxu1 }
 0x1a2   : > { %v1725_v37 = vpop.f32.mrf.mxu0 }
 0x1a3   : > { %v1874_v8 = vpop.f32.mrf.mxu1 }
 0x1a4   : > { %v1728_v11 = vpop.f32.mrf.mxu0  ;;  %v1870_v8 = vadd.f32 %v4492_v30, %v4490_v28 }
 0x1a5   : > { %v1877_v41 = vpop.f32.mrf.mxu1 }
 0x1a6   : > { %v1730_v43 = vpop.f32.mrf.mxu0  ;;  %v1878_v31 = vadd.f32 %v1877_v41, %v1728_v11 }
 0x1a7   : > { %v1879_v22 = vpop.f32.mrf.mxu1  ;;  %v1873_v43 = vadd.f32 %v4496_v36, %v4494_v1 }
 0x1a8   : > { %v1731_v39 = vpop.f32.mrf.mxu0 }
 0x1a9   : > { %v1880_v44 = vpop.f32.mrf.mxu1 }
 0x1aa   : > { %v1733_v45 = vpop.f32.mrf.mxu0  ;;  %v1881_v22 = vadd.f32 %v1880_v44, %v1731_v39 }
 0x1ab   : > { %v1882_v47 = vpop.f32.mrf.mxu1 }
 0x1b1   : > { %v797_v26 = vpop.permute.xlu0 %796 }
 0x1b2   : > { %v799_v50 = vmax.f32 %v4453_v27, %v797_v26 }
 0x1b4   : > { %v807_v42 = vadd.f32 %v4501_v49, %v799_v50 }
 0x1b6   : > { %vm808_vm1 = vcmp.ge.f32.partialorder %v807_v42, 0.0  ;;  %v809_v51 = vmul.f32 0.3, %v807_v42 }
 0x1b8   : > { %v810_v54 = vsel %vm808_vm1, %v807_v42, %v809_v51 }
 0x1b9   : > { %811 = vst.msk [vmem:[%s4509_s22] sm:$0xff] %vm339_vm0, %v810_v54 }
 0x1bc   : > { %v2070_v29 = vpop.f32.mrf.mxu0 }
 0x1bd   : > { %v4513_v35 = vpop.f32.mrf.mxu1  ;;  %v2101_v16 = vadd.f32 %v2070_v29, %v1854_v3 }
 0x1be   : > { %v2072_v57 = vpop.f32.mrf.mxu0 }
 0x1bf   : > { %v2365_v25 = vpop.f32.mrf.mxu1 }
 0x1c0   : > { %v2073_v27 = vpop.f32.mrf.mxu0 }
 0x1c1   : > { %v4515_v32 = vpop.f32.mrf.mxu1  ;;  %v817_v33 = vpop.permute.xlu0 %816  ;;  %v2102_v61 = vadd.f32 %v2073_v27, %v1857_v6 }
 0x1c2   : > { %v819_v48 = vmax.f32 %v4474_v20, %v817_v33  ;;  %v2075_v58 = vpop.f32.mrf.mxu0 }
 0x1c3   : > { %v2368_v38 = vpop.f32.mrf.mxu1 }
 0x1c4   : > { %v827_v59 = vadd.f32 %v4501_v49, %v819_v48  ;;  %v2078_v63 = vpop.f32.mrf.mxu0 }
 0x1c5   : > { %v2103_v10 = vadd.f32 %v2078_v63, %v1862_v40 }
 0x1c6   : > { %vm828_vm2 = vcmp.ge.f32.partialorder %v827_v59, 0.0  ;;  %v829_v0 = vmul.f32 0.3, %v827_v59  ;;  %v2080_v2 = vpop.f32.mrf.mxu0 }
 0x1c7   : > { %v2371_v5 = vpop.f32.mrf.mxu1  ;;  %v2109_v53 = vmax.f32 %v2101_v16, %v2103_v10 }
 0x1c8   : > { %v830_v15 = vsel %vm828_vm2, %v827_v59, %v829_v0  ;;  %v2081_v52 = vpop.f32.mrf.mxu0 }
 0x1c9   : > { %2989 = vst.msk [vmem:[%s4509_s22 + $0x8] sm:$0xff] %vm339_vm0, %v830_v15  ;;  %v2104_v20 = vadd.f32 %v2081_v52, %v1865_v9  ;;  %v2373_v4 = vpop.f32.mrf.mxu1 }
 0x1ca   : > { %v2083_v19 = vpop.f32.mrf.mxu0 }
 0x1cb   : > { %v2110_v62 = vmax.f32 %v2102_v61, %v2104_v20  ;;  %v2374_v56 = vpop.f32.mrf.mxu1 }
 0x1cc   : > { %v2086_v60 = vpop.f32.mrf.mxu0 }
 0x1cd   : > { %v4521_v13 = vmax.f32 %v2109_v53, %v2110_v62  ;;  %v2376_v46 = vpop.f32.mrf.mxu1  ;;  %v2105_v50 = vadd.f32 %v2086_v60, %v1870_v8 }
 0x1ce   : > { %v2088_v12 = vpop.f32.mrf.mxu0 }
 0x1cf   : > { %2113 = vrot.lane.b32.xlu0 %v4521_v13, %s3565_s16  ;;  %v4525_v7 = vpop.f32.mrf.mxu1 }
 0x1d0   : > { %v2089_v18 = vpop.f32.mrf.mxu0 }
 0x1d1   : > { %v2381_v14 = vpop.f32.mrf.mxu1  ;;  %v2106_v42 = vadd.f32 %v2089_v18, %v1873_v43 }
 0x1d2   : > { %v2091_v21 = vpop.f32.mrf.mxu0 }
 0x1d3   : > { %v4527_v23 = vpop.f32.mrf.mxu1 }
 0x1d4   : > { %v2094_v24 = vpop.f32.mrf.mxu0 }
 0x1d5   : > { %v2384_v34 = vpop.f32.mrf.mxu1  ;;  %v2107_v45 = vadd.f32 %v2094_v24, %v1878_v31 }
 0x1d6   : > { %v2096_v37 = vpop.f32.mrf.mxu0 }
 0x1d7   : > { %v4533_v47 = vpop.f32.mrf.mxu1  ;;  %v2130_v11 = vmax.f32 %v2105_v50, %v2107_v45 }
 0x1d8   : > { %v2097_v26 = vpop.f32.mrf.mxu0 }
 0x1d9   : > { %v2108_v51 = vadd.f32 %v2097_v26, %v1881_v22  ;;  %v2389_v54 = vpop.f32.mrf.mxu1 }
 0x1da   : > { %v2099_v29 = vpop.f32.mrf.mxu0 }
 0x1db   : > { %v2131_v41 = vmax.f32 %v2106_v42, %v2108_v51  ;;  %v4535_v57 = vpop.f32.mrf.mxu1 }
 0x1dd   : > { %v4537_v25 = vmax.f32 %v2130_v11, %v2131_v41  ;;  %v2392_v28 = vpop.f32.mrf.mxu1 }
 0x1df   : > { %2134 = vrot.lane.b32.xlu1 %v4537_v25, %s3565_s16 }
 0x1e3   : > { %v1455_v30 = vpop.permute.xlu1 %1454 }
 0x1e4   : > { %v1457_v1 = vmax.f32 %v4480_v55, %v1455_v30 }
 0x1e6   : > { %v1465_v36 = vadd.f32 %v4501_v49, %v1457_v1 }
 0x1e8   : > { %vm1466_vm3 = vcmp.ge.f32.partialorder %v1465_v36, 0.0  ;;  %v1467_v39 = vmul.f32 0.3, %v1465_v36 }
 0x1ea   : > { %v1468_v44 = vsel %vm1466_vm3, %v1465_v36, %v1467_v39 }
 0x1eb   : > { %3105 = vst.msk [vmem:[%s4509_s22 + $0x10] sm:$0xff] %vm339_vm0, %v1468_v44 }
 0x1ec   : > { %v2512_v27 = vpop.f32.mrf.mxu0 }
 0x1ed   : > { %v2729_v33 = vpop.f32.mrf.mxu1  ;;  %v2513_v15 = vadd.f32 %v2512_v27, %v4513_v35 }
 0x1ee   : > { %v2514_v48 = vpop.f32.mrf.mxu0 }
 0x1ef   : > { %v2731_v58 = vpop.f32.mrf.mxu1  ;;  %v2760_v60 = vadd.f32 %v2729_v33, %v2513_v15 }
 0x1f0   : > { %v2515_v38 = vpop.f32.mrf.mxu0 }
 0x1f1   : > { %v2732_v59 = vpop.f32.mrf.mxu1  ;;  %v2516_v52 = vadd.f32 %v2515_v38, %v4515_v32 }
 0x1f2   : > { %v2517_v63 = vpop.f32.mrf.mxu0 }
 0x1f3   : > { %v2734_v40 = vpop.f32.mrf.mxu1  ;;  %v1476_v0 = vpop.permute.xlu1 %1475 }
 0x1f4   : > { %v1478_v2 = vmax.f32 %v4486_v17, %v1476_v0  ;;  %v2520_v3 = vpop.f32.mrf.mxu0 }
 0x1f5   : > { %v2521_v55 = vadd.f32 %v2520_v3, %v2371_v5  ;;  %v2737_v6 = vpop.f32.mrf.mxu1  ;;  %v2761_v5 = vadd.f32 %v2732_v59, %v2516_v52 }
 0x1f6   : > { %v1486_v9 = vadd.f32 %v4501_v49, %v1478_v2  ;;  %v2522_v10 = vpop.f32.mrf.mxu0 }
 0x1f7   : > { %v2739_v16 = vpop.f32.mrf.mxu1  ;;  %v2762_v4 = vadd.f32 %v2737_v6, %v2521_v55 }
 0x1f8   : > { %vm1487_vm4 = vcmp.ge.f32.partialorder %v1486_v9, 0.0  ;;  %v1488_v61 = vmul.f32 0.3, %v1486_v9  ;;  %v2523_v20 = vpop.f32.mrf.mxu0 }
 0x1f9   : > { %v2524_v19 = vadd.f32 %v2523_v20, %v2374_v56  ;;  %v2740_v53 = vpop.f32.mrf.mxu1  ;;  %v2768_v14 = vmax.f32 %v2760_v60, %v2762_v4 }
 0x1fa   : > { %v1489_v62 = vsel %vm1487_vm4, %v1486_v9, %v1488_v61  ;;  %v2525_v17 = vpop.f32.mrf.mxu0 }
 0x1fb   : > { %3107 = vst.msk [vmem:[%s4509_s22 + $0x18] sm:$0xff] %vm339_vm0, %v1489_v62  ;;  %v2763_v46 = vadd.f32 %v2740_v53, %v2524_v19  ;;  %v2742_v12 = vpop.f32.mrf.mxu1 }
 0x1fc   : > { %v2528_v18 = vpop.f32.mrf.mxu0 }
 0x1fd   : > { %v2769_v35 = vmax.f32 %v2761_v5, %v2763_v46  ;;  %v2745_v21 = vpop.f32.mrf.mxu1  ;;  %v2529_v50 = vadd.f32 %v2528_v18, %v4525_v7 }
 0x1fe   : > { %v2530_v32 = vpop.f32.mrf.mxu0 }
 0x1ff   : > { %v2747_v24 = vpop.f32.mrf.mxu1  ;;  %v2770_v31 = vmax.f32 %v2768_v14, %v2769_v35  ;;  %v2764_v30 = vadd.f32 %v2745_v21, %v2529_v50 }
 0x200   : > { %v2531_v34 = vpop.f32.mrf.mxu0 }
 0x201   : > { %v2748_v37 = vpop.f32.mrf.mxu1  ;;  %2772 = vrot.lane.b32.xlu0 %v2770_v31, %s3565_s16  ;;  %v2532_v42 = vadd.f32 %v2531_v34, %v4527_v23 }
 0x202   : > { %v2533_v56 = vpop.f32.mrf.mxu0 }
 0x203   : > { %v2750_v8 = vpop.f32.mrf.mxu1  ;;  %v2765_v1 = vadd.f32 %v2748_v37, %v2532_v42 }
 0x204   : > { %v2536_v43 = vpop.f32.mrf.mxu0 }
 0x205   : > { %v2537_v22 = vadd.f32 %v2536_v43, %v4533_v47  ;;  %v2753_v45 = vpop.f32.mrf.mxu1 }
 0x206   : > { %v2538_v26 = vpop.f32.mrf.mxu0 }
 0x207   : > { %v2755_v51 = vpop.f32.mrf.mxu1  ;;  %v2766_v29 = vadd.f32 %v2753_v45, %v2537_v22 }
 0x208   : > { %v2539_v54 = vpop.f32.mrf.mxu0 }
 0x209   : > { %v2540_v11 = vadd.f32 %v2539_v54, %v4535_v57  ;;  %v2756_v41 = vpop.f32.mrf.mxu1  ;;  %v2789_v44 = vmax.f32 %v2764_v30, %v2766_v29 }
 0x20a   : > { %v2541_v28 = vpop.f32.mrf.mxu0 }
 0x20b   : > { %v2767_v36 = vadd.f32 %v2756_v41, %v2540_v11  ;;  %v2758_v39 = vpop.f32.mrf.mxu1 }
 0x20d   : > { %v2790_v47 = vmax.f32 %v2765_v1, %v2767_v36 }
 0x20f   : > { %v2791_v27 = vmax.f32 %v2789_v44, %v2790_v47 }
 0x211   : > { %2793 = vrot.lane.b32.xlu1 %v2791_v27, %s3565_s16 }
 0x241   : > { %v2114_v7 = vpop.permute.xlu0 %2113 }
 0x242   : > { %v2116_v23 = vmax.f32 %v4521_v13, %v2114_v7 }
 0x244   : > { %v2124_v33 = vadd.f32 %v4501_v49, %v2116_v23 }
 0x246   : > { %vm2125_vm5 = vcmp.ge.f32.partialorder %v2124_v33, 0.0  ;;  %v2126_v57 = vmul.f32 0.3, %v2124_v33 }
 0x248   : > { %v2127_v48 = vsel %vm2125_vm5, %v2124_v33, %v2126_v57 }
 0x249   : > { %3223 = vst.msk [vmem:[%s4509_s22 + $0x20] sm:$0xff] %vm339_vm0, %v2127_v48 }
 0x251   : > { %v2135_v58 = vpop.permute.xlu1 %2134 }
 0x252   : > { %v2137_v38 = vmax.f32 %v4537_v25, %v2135_v58 }
 0x254   : > { %v2145_v59 = vadd.f32 %v4501_v49, %v2137_v38 }
 0x256   : > { %vm2146_vm6 = vcmp.ge.f32.partialorder %v2145_v59, 0.0  ;;  %v2147_v63 = vmul.f32 0.3, %v2145_v59 }
 0x258   : > { %v2148_v40 = vsel %vm2146_vm6, %v2145_v59, %v2147_v63 }
 0x259   : > { %3225 = vst.msk [vmem:[%s4509_s22 + $0x28] sm:$0xff] %vm339_vm0, %v2148_v40 }
 0x273   : > { %v2773_v13 = vpop.permute.xlu0 %2772 }
 0x274   : > { %v2775_v0 = vmax.f32 %v2770_v31, %v2773_v13 }
 0x276   : > { %v2783_v2 = vadd.f32 %v4501_v49, %v2775_v0 }
 0x278   : > { %vm2784_vm7 = vcmp.ge.f32.partialorder %v2783_v2, 0.0  ;;  %v2785_v3 = vmul.f32 0.3, %v2783_v2 }
 0x27a   : > { %v2786_v55 = vsel %vm2784_vm7, %v2783_v2, %v2785_v3 }
 0x27b   : > { %3341 = vst.msk [vmem:[%s4509_s22 + $0x30] sm:$0xff] %vm339_vm0, %v2786_v55 }
 0x283   : > { %v2794_v6 = vpop.permute.xlu1 %2793 }
 0x284   : > { %v2796_v9 = vmax.f32 %v2791_v27, %v2794_v6 }
 0x286   : > { %v2804_v25 = vadd.f32 %v4501_v49, %v2796_v9 }
 0x288   : > { %vm2805_vm8 = vcmp.ge.f32.partialorder %v2804_v25, 0.0  ;;  %v2806_v10 = vmul.f32 0.3, %v2804_v25 }
 0x28a   : > { %v2807_v15 = vsel %vm2805_vm8, %v2804_v25, %v2806_v10 }
 0x28b   : > { %3343 = vst.msk [vmem:[%s4509_s22 + $0x38] sm:$0xff] %vm339_vm0, %v2807_v15 }
 0x28c PF: > { %s13_s12 = sadd.s32 1, %s3562_s12  }
 0x28d   : > { %p10_p4 = scmp.ge.s32.totalorder %s13_s12, 4  }
 0x28f   :  { %12 = sbr.rel (!%p10_p4) target bundleno = 1 (0x1), region = 71 }

</bundles_post_ra>
